<compile_context>
chip_gen: v7x
topology: tpu7x:2x2x1
jax: 0.10.0
libtpu: 0.0.40
codegen_flags: <defaults>
</compile_context>

<pallas_src>
import functools
import math

import jax
import jax.numpy as jnp
from jax import lax
from jax.experimental import pallas as pl
from jax.experimental.pallas import tpu as pltpu


# ----------------------------- small helpers -----------------------------

def _round_up(v, m):
    return ((v + m - 1) // m) * m


def _layernorm(v, g, b, eps):
    mu = jnp.mean(v, axis=-1, keepdims=True)
    c = v - mu
    var = jnp.mean(c * c, axis=-1, keepdims=True)
    return c * lax.rsqrt(var + eps) * g + b


def _erf_poly(x):
    # Abramowitz & Stegun 7.1.26, |err| <= 1.5e-7 -> exact-GELU without lax.erf.
    # The divide goes to the EUP (approx reciprocal + one Newton step).
    p = 0.3275911
    a1, a2, a3, a4, a5 = 0.254829592, -0.284496736, 1.421413741, -1.453152027, 1.061405429
    ax = jnp.abs(x)
    den = 1.0 + p * ax
    t = pl.reciprocal(den, approx=True)
    t = t * (2.0 - den * t)                      # Newton step -> ~f32 accurate
    poly = ((((a5 * t + a4) * t + a3) * t + a2) * t + a1) * t
    y = 1.0 - poly * jnp.exp(-ax * ax)
    return jnp.where(x >= 0, y, -y)


def _gelu_exact(x):
    return 0.5 * x * (1.0 + _erf_poly(x * 0.7071067811865476))


# ------------------------------- block kernel --------------------------------

def _block_kernel(x_ref, ln1g_ref, ln1b_ref, wqkv_ref, bqkv_ref, wo_ref, bo_ref,
                  ln2g_ref, ln2b_ref, w1_ref, b1_ref, w2_ref, b2_ref, *rest,
                  num_heads, head_size, eps, vis, fuse_final_ln, q_rows, seq_len):
    rest = list(rest)
    if fuse_final_ln:
        encg_ref, encb_ref = rest[0], rest[1]
        rest = rest[2:]
    out_ref = rest[0]
    rest = rest[1:]
    if vis:
        probs_ref = rest[0]
        rest = rest[1:]
    qkv_sc, ctx_sc = rest                          # VMEM scratch (compute dtype)

    f32 = jnp.float32
    cd = wqkv_ref.dtype                            # MXU operand dtype (bf16 or f32)
    d = head_size
    hidden = num_heads * d
    s_pad = x_ref.shape[1]
    qt = q_rows
    row0 = pl.multiple_of(pl.program_id(1) * qt, 8)

    # ---- LayerNorm_0 over the full (padded) sequence + fused QKV projection ----
    x_full = x_ref[0].astype(f32)                                  # (S_pad, H)
    xn = _layernorm(x_full, ln1g_ref[0], ln1b_ref[0], eps)
    qkv = jnp.dot(xn.astype(cd), wqkv_ref[...],
                  preferred_element_type=f32) + bqkv_ref[0]        # (S_pad, 3H) f32
    qkv_sc[...] = qkv.astype(cd)                                   # stage in VMEM

    masked = seq_len != s_pad                                      # static
    if masked:
        col_valid = lax.broadcasted_iota(jnp.int32, (qt, s_pad), 1) < seq_len

    # ---- multi-head attention on this grid step's query rows [row0, row0+qt) ----
    # ctx_sc needs no init: every head writes its full d-wide slice each grid step.
    for h in range(num_heads):
        q_h = qkv_sc[pl.ds(row0, qt), h * d:(h + 1) * d]                   # (qt, d)
        k_h = qkv_sc[:, hidden + h * d:hidden + (h + 1) * d]               # (S_pad, d)
        v_h = qkv_sc[:, 2 * hidden + h * d:2 * hidden + (h + 1) * d]       # (S_pad, d)
        # q @ k^T with the transpose absorbed by the MXU (no relayout / copy).
        scores = lax.dot_general(q_h, k_h, (((1,), (1,)), ((), ())),
                                 preferred_element_type=f32)               # (qt, S_pad)
        if masked:
            scores = jnp.where(col_valid, scores, -1e30)
        m = jnp.max(scores, axis=-1, keepdims=True)
        e = jnp.exp(scores - m)
        den = jnp.sum(e, axis=-1, keepdims=True)
        inv = pl.reciprocal(den, approx=True)                              # EUP vrcp
        inv = inv * (2.0 - den * inv)                                      # Newton step
        probs = e * inv
        if vis:
            probs_ref[0, h] = probs.astype(probs_ref.dtype)
        ctx_sc[:, h * d:(h + 1) * d] = jnp.dot(
            probs.astype(cd), v_h, preferred_element_type=f32).astype(cd)

    attn_out = jnp.dot(ctx_sc[...], wo_ref[...],
                       preferred_element_type=f32) + bo_ref[0]             # (qt, H)
    x_rows = x_ref[0, pl.ds(row0, qt), :].astype(f32)
    h1 = x_rows + attn_out                                                 # residual

    # ---- LayerNorm_2 + MLP (exact erf-GELU) ----
    xn2 = _layernorm(h1, ln2g_ref[0], ln2b_ref[0], eps)
    f = jnp.dot(xn2.astype(cd), w1_ref[...], preferred_element_type=f32) + b1_ref[0]
    f = _gelu_exact(f)
    mlp = jnp.dot(f.astype(cd), w2_ref[...], preferred_element_type=f32) + b2_ref[0]
    y = h1 + mlp

    if fuse_final_ln:                             # fused encoder_norm epilogue
        y = _layernorm(y, encg_ref[0], encb_ref[0], eps)

    out_ref[0] = y.astype(out_ref.dtype)


def block_forward(x, params, num_heads, *, vis=True, eps=1e-6, q_block=None,
                  probs_dtype=None, final_ln=None,
                  vmem_limit_bytes=48 * 1024 * 1024):
    """One transformer Block (pre-LN attention + MLP, both with residuals).

    q_block: query rows per grid step (second parallel grid axis; multiple of 8).
    final_ln: optional (gamma, beta) -> fuse the trailing encoder_norm into this block.
    vmem_limit_bytes: raise to ~96-128 MiB on v5e/v6e for f32 weights at ViT-Base;
                      keep <= ~56 MiB on v7x (use bf16 matmul weights there).
    """
    B, S, H = x.shape
    d = H // num_heads
    (ln1g, ln1b, wqkv, bqkv, wo, bo, ln2g, ln2b, w1, b1, w2, b2) = params
    cd = wqkv.dtype

    # ---- pad the sequence to a sublane multiple (e.g. ViT's 197 -> 200/256) ----
    s_pad = _round_up(S, 8)
    x_p = x if s_pad == S else jnp.pad(x, ((0, 0), (0, s_pad - S), (0, 0)))

    # ---- choose query-row tiling (keeps both v7x TensorCores busy at B=1) ----
    if q_block is None or q_block % 8 or q_block >= s_pad or s_pad % q_block:
        qt = s_pad
    else:
        qt = q_block
    nq = s_pad // qt

    # ---- fold 1/sqrt(head_size) into the Q columns of the fused QKV weight/bias ----
    # (production: do this once at parameter-load time instead of per call)
    scale = 1.0 / math.sqrt(d)
    col_scale = jnp.concatenate([jnp.full((H,), scale, jnp.float32),
                                 jnp.ones((2 * H,), jnp.float32)])
    wqkv_s = (wqkv.astype(jnp.float32) * col_scale[None, :]).astype(wqkv.dtype)
    bqkv_s = (bqkv.astype(jnp.float32) * col_scale[None, :]).astype(bqkv.dtype)

    kernel = functools.partial(
        _block_kernel, num_heads=num_heads, head_size=d, eps=eps, vis=vis,
        fuse_final_ln=final_ln is not None, q_rows=qt, seq_len=S)

    # Replicated weights/biases: whole array resident in VMEM once (no per-step
    # double-buffered DMA of constant blocks).
    W = pl.BlockSpec(memory_space=pltpu.MemorySpace.VMEM)
    in_specs = [pl.BlockSpec((1, s_pad, H), lambda b, qi: (b, 0, 0))] + [W] * 12
    inputs = [x_p, ln1g, ln1b, wqkv_s, bqkv_s, wo, bo, ln2g, ln2b, w1, b1, w2, b2]
    if final_ln is not None:
        in_specs += [W, W]
        inputs += [final_ln[0], final_ln[1]]

    out_specs = [pl.BlockSpec((1, qt, H), lambda b, qi: (b, qi, 0))]
    out_shape = [jax.ShapeDtypeStruct((B, s_pad, H), x.dtype)]
    if vis:
        pdt = x.dtype if probs_dtype is None else probs_dtype
        out_specs.append(pl.BlockSpec((1, num_heads, qt, s_pad),
                                      lambda b, qi: (b, 0, qi, 0)))
        out_shape.append(jax.ShapeDtypeStruct((B, num_heads, s_pad, s_pad), pdt))

    res = pl.pallas_call(
        kernel,
        out_shape=tuple(out_shape),
        grid_spec=pltpu.PrefetchScalarGridSpec(
            num_scalar_prefetch=0,
            grid=(B, nq),
            in_specs=in_specs,
            out_specs=tuple(out_specs),
            scratch_shapes=[pltpu.VMEM((s_pad, 3 * H), cd),   # staged QKV
                            pltpu.VMEM((qt, H), cd)],         # per-step ctx
        ),
        compiler_params=pltpu.CompilerParams(
            dimension_semantics=("parallel", "parallel"),
            vmem_limit_bytes=vmem_limit_bytes),
    )(*inputs)

    out = res[0]
    if s_pad != S:
        out = out[:, :S, :]
    if vis:
        probs = res[1]
        if s_pad != S:
            probs = probs[:, :, :S, :S]
        return out, probs
    return out, None


# ------------------------------ standalone LayerNorm --------------------------
# Only used when the encoder has zero layers (normally encoder_norm is fused into
# the last block's kernel).

def _layernorm_kernel(x_ref, g_ref, b_ref, out_ref, *, eps):
    x = x_ref[0].astype(jnp.float32)
    out_ref[0] = _layernorm(x, g_ref[0], b_ref[0], eps).astype(out_ref.dtype)


def layernorm_forward(x, g, b, *, eps=1e-6):
    B, S, H = x.shape
    return pl.pallas_call(
        functools.partial(_layernorm_kernel, eps=eps),
        out_shape=jax.ShapeDtypeStruct((B, S, H), x.dtype),
        grid_spec=pltpu.PrefetchScalarGridSpec(
            num_scalar_prefetch=0,
            grid=(B,),
            in_specs=[pl.BlockSpec((1, S, H), lambda i: (i, 0, 0)),
                      pl.BlockSpec(memory_space=pltpu.MemorySpace.VMEM),
                      pl.BlockSpec(memory_space=pltpu.MemorySpace.VMEM)],
            out_specs=pl.BlockSpec((1, S, H), lambda i: (i, 0, 0)),
        ),
        compiler_params=pltpu.CompilerParams(dimension_semantics=("parallel",)),
    )(x, g, b)


# -------------------------------- Encoder API ---------------------------------

def encoder_forward(hidden_states, layer_params, encoder_norm_params, num_heads,
                    *, vis=True, eps=1e-6, q_block=None, probs_dtype=None,
                    vmem_limit_bytes=48 * 1024 * 1024):
    """Matches Encoder.forward: returns (encoded, attn_weights list)."""
    attn_weights = []
    x = hidden_states
    n = len(layer_params)
    if n == 0:
        enc_g, enc_b = encoder_norm_params
        return layernorm_forward(x, enc_g, enc_b, eps=eps), attn_weights
    for li, params in enumerate(layer_params):
        final_ln = encoder_norm_params if li == n - 1 else None
        x, probs = block_forward(x, params, num_heads, vis=vis, eps=eps,
                                 q_block=q_block, probs_dtype=probs_dtype,
                                 final_ln=final_ln,
                                 vmem_limit_bytes=vmem_limit_bytes)
        if vis:
            attn_weights.append(probs)
    return x, attn_weights


# ----------------------------- params / reference -----------------------------

def _init_encoder_params(key, num_layers, hidden, mlp_dim):
    def normal(k, shape, std):
        return std * jax.random.normal(k, shape, jnp.float32)

    layers = []
    for l in range(num_layers):
        ks = jax.random.split(jax.random.fold_in(key, l), 12)
        layers.append((
            1.0 + normal(ks[0], (1, hidden), 0.1),        # LayerNorm_0 scale
            normal(ks[1], (1, hidden), 0.05),             # LayerNorm_0 bias
            normal(ks[2], (hidden, 3 * hidden), 0.08),    # fused Wqkv  [in, 3*out]
            normal(ks[3], (1, 3 * hidden), 0.02),         # fused bqkv
            normal(ks[4], (hidden, hidden), 0.08),        # Wo  [in, out]
            normal(ks[5], (1, hidden), 0.02),             # bo
            1.0 + normal(ks[6], (1, hidden), 0.1),        # LayerNorm_2 scale
            normal(ks[7], (1, hidden), 0.05),             # LayerNorm_2 bias
            normal(ks[8], (hidden, mlp_dim), 0.08),       # fc1 [in, out]
            normal(ks[9], (1, mlp_dim), 0.02),            # fc1 bias
            normal(ks[10], (mlp_dim, hidden), 0.08),      # fc2 [in, out]
            normal(ks[11], (1, hidden), 0.02),            # fc2 bias
        ))
    ke = jax.random.split(jax.random.fold_in(key, num_layers), 2)
    enc_norm = (1.0 + normal(ke[0], (1, hidden), 0.1),
                normal(ke[1], (1, hidden), 0.05))
    return layers, enc_norm


def _cast_matmul_weights(layer_params, dtype):
    cast_idx = {2, 4, 8, 10}   # wqkv, wo, fc1, fc2 (biases / LN params stay f32)
    return [tuple(p.astype(dtype) if i in cast_idx else p for i, p in enumerate(params))
            for params in layer_params]


def _encoder_reference(x, layer_params, encoder_norm_params, num_heads,
                       *, eps=1e-6, compute_dtype=jnp.float32):
    """Pure-JAX mirror of the PyTorch Encoder forward (dropout = identity)."""
    f32 = jnp.float32
    B, S, H = x.shape
    d = H // num_heads

    def ln(v, g, b):
        mu = v.mean(-1, keepdims=True)
        c = v - mu
        var = (c * c).mean(-1, keepdims=True)
        return c * lax.rsqrt(var + eps) * g + b

    def mm(a, w):
        return jnp.dot(a.astype(compute_dtype), w.astype(compute_dtype),
                       preferred_element_type=f32)

    h = x.astype(f32)
    attn_list = []
    for (ln1g, ln1b, wqkv, bqkv, wo, bo, ln2g, ln2b, w1, b1, w2, b2) in layer_params:
        xn = ln(h, ln1g[0], ln1b[0])
        qkv = mm(xn, wqkv) + bqkv[0]
        q, k, v = qkv[..., :H], qkv[..., H:2 * H], qkv[..., 2 * H:]

        def split(t):
            return t.reshape(B, S, num_heads, d).transpose(0, 2, 1, 3)

        qh, kh, vh = split(q), split(k), split(v)
        scores = jnp.einsum("bhqd,bhkd->bhqk",
                            qh.astype(compute_dtype), kh.astype(compute_dtype),
                            preferred_element_type=f32) / math.sqrt(d)
        probs = jax.nn.softmax(scores, axis=-1)
        attn_list.append(probs)
        ctx = jnp.einsum("bhqk,bhkd->bhqd",
                         probs.astype(compute_dtype), vh.astype(compute_dtype),
                         preferred_element_type=f32)
        ctx = ctx.transpose(0, 2, 1, 3).reshape(B, S, H)
        h = h + mm(ctx, wo) + bo[0]

        xn2 = ln(h, ln2g[0], ln2b[0])
        f = jax.nn.gelu(mm(xn2, w1) + b1[0], approximate=False)
        h = h + mm(f, w2) + b2[0]

    enc_g, enc_b = encoder_norm_params
    return ln(h, enc_g[0], enc_b[0]), attn_list


# ------------------------------------ main ------------------------------------

if __name__ == "__main__":
    # Small config: batch=2, seq=16, hidden=32, heads=4, mlp_dim=64, layers=2.
    B, S, H, NH, MLP, L = 2, 16, 32, 4, 64, 2

    key = jax.random.PRNGKey(0)
    k_x, k_p, k_x3 = jax.random.split(key, 3)
    x = jax.random.normal(k_x, (B, S, H), jnp.float32)
    layer_params, enc_norm = _init_encoder_params(k_p, L, H, MLP)

    # --- Test 1: f32, vis=True, 2 query-row tiles (2-D parallel grid) ---
    encoded, attn_weights = encoder_forward(x, layer_params, enc_norm, NH,
                                            vis=True, q_block=8)
    jax.block_until_ready(encoded)
    ref_enc, ref_probs = _encoder_reference(x, layer_params, enc_norm, NH,
                                            compute_dtype=jnp.float32)
    assert jnp.allclose(encoded, ref_enc, atol=2e-3, rtol=2e-3), \
        float(jnp.max(jnp.abs(encoded - ref_enc)))
    assert len(attn_weights) == L
    for got, want in zip(attn_weights, ref_probs):
        assert got.shape == (B, NH, S, S)
        assert jnp.allclose(got, want, atol=2e-3, rtol=2e-3), \
            float(jnp.max(jnp.abs(got - want)))

    # --- Test 2: bf16 matmul operands (f32 accumulation/softmax), vis=False ---
    layer_params_bf16 = _cast_matmul_weights(layer_params, jnp.bfloat16)
    encoded_bf16, attn_bf16 = encoder_forward(x, layer_params_bf16, enc_norm, NH,
                                              vis=False)
    jax.block_until_ready(encoded_bf16)
    assert attn_bf16 == []
    ref_bf16, _ = _encoder_reference(x, layer_params_bf16, enc_norm, NH,
                                     compute_dtype=jnp.bfloat16)
    assert jnp.allclose(encoded_bf16, ref_bf16, atol=3e-2, rtol=3e-2), \
        float(jnp.max(jnp.abs(encoded_bf16 - ref_bf16)))

    # --- Test 3: unaligned sequence length (padding + key-mask path), batch=1 ---
    x3 = jax.random.normal(k_x3, (1, 12, H), jnp.float32)
    enc3, attn3 = encoder_forward(x3, layer_params[:1], enc_norm, NH, vis=True)
    jax.block_until_ready(enc3)
    ref3, ref3_probs = _encoder_reference(x3, layer_params[:1], enc_norm, NH,
                                          compute_dtype=jnp.float32)
    assert enc3.shape == (1, 12, H)
    assert jnp.allclose(enc3, ref3, atol=2e-3, rtol=2e-3), \
        float(jnp.max(jnp.abs(enc3 - ref3)))
    assert attn3[0].shape == (1, NH, 12, 12)
    assert jnp.allclose(attn3[0], ref3_probs[0], atol=2e-3, rtol=2e-3), \
        float(jnp.max(jnp.abs(attn3[0] - ref3_probs[0])))

    print("KERNEL_OK")
</pallas_src>

<mosaic_0001>
module attributes {stable_mosaic.version = 11 : i64} {
  func.func @_block_kernel(%arg0: i32, %arg1: i32, %arg2: memref<1x16x32xf32, #tpu.memory_space<vmem>>, %arg3: memref<1x32xf32, #tpu.memory_space<vmem>>, %arg4: memref<1x32xf32, #tpu.memory_space<vmem>>, %arg5: memref<32x96xf32, #tpu.memory_space<vmem>>, %arg6: memref<1x96xf32, #tpu.memory_space<vmem>>, %arg7: memref<32x32xf32, #tpu.memory_space<vmem>>, %arg8: memref<1x32xf32, #tpu.memory_space<vmem>>, %arg9: memref<1x32xf32, #tpu.memory_space<vmem>>, %arg10: memref<1x32xf32, #tpu.memory_space<vmem>>, %arg11: memref<32x64xf32, #tpu.memory_space<vmem>>, %arg12: memref<1x64xf32, #tpu.memory_space<vmem>>, %arg13: memref<64x32xf32, #tpu.memory_space<vmem>>, %arg14: memref<1x32xf32, #tpu.memory_space<vmem>>, %arg15: memref<1x8x32xf32, #tpu.memory_space<vmem>>, %arg16: memref<1x4x8x16xf32, #tpu.memory_space<vmem>>, %arg17: memref<16x96xf32, #tpu.memory_space<vmem>>, %arg18: memref<8x32xf32, #tpu.memory_space<vmem>>) attributes {dimension_semantics = [#tpu.dimension_semantics<parallel>, #tpu.dimension_semantics<parallel>], iteration_bounds = array<i64: 2, 2>, scalar_prefetch = 0 : i64, scratch_operands = 2 : i64, tpu.core_type = #tpu.core_type<tc>, window_params = [{transform_indices = @transform_0, window_bounds = array<i64: 1, 16, 32>}, {pipeline_mode = #tpu.pipeline_mode<synchronous>, transform_indices = @transform_1, window_bounds = array<i64: 1, 32>}, {pipeline_mode = #tpu.pipeline_mode<synchronous>, transform_indices = @transform_2, window_bounds = array<i64: 1, 32>}, {pipeline_mode = #tpu.pipeline_mode<synchronous>, transform_indices = @transform_3, window_bounds = array<i64: 32, 96>}, {pipeline_mode = #tpu.pipeline_mode<synchronous>, transform_indices = @transform_4, window_bounds = array<i64: 1, 96>}, {pipeline_mode = #tpu.pipeline_mode<synchronous>, transform_indices = @transform_5, window_bounds = array<i64: 32, 32>}, {pipeline_mode = #tpu.pipeline_mode<synchronous>, transform_indices = @transform_6, window_bounds = array<i64: 1, 32>}, {pipeline_mode = #tpu.pipeline_mode<synchronous>, transform_indices = @transform_7, window_bounds = array<i64: 1, 32>}, {pipeline_mode = #tpu.pipeline_mode<synchronous>, transform_indices = @transform_8, window_bounds = array<i64: 1, 32>}, {pipeline_mode = #tpu.pipeline_mode<synchronous>, transform_indices = @transform_9, window_bounds = array<i64: 32, 64>}, {pipeline_mode = #tpu.pipeline_mode<synchronous>, transform_indices = @transform_10, window_bounds = array<i64: 1, 64>}, {pipeline_mode = #tpu.pipeline_mode<synchronous>, transform_indices = @transform_11, window_bounds = array<i64: 64, 32>}, {pipeline_mode = #tpu.pipeline_mode<synchronous>, transform_indices = @transform_12, window_bounds = array<i64: 1, 32>}, {transform_indices = @transform_13, window_bounds = array<i64: 1, 8, 32>}, {transform_indices = @transform_14, window_bounds = array<i64: 1, 4, 8, 16>}]} {
    %c8_i32 = arith.constant 8 : i32
    %0 = arith.muli %arg1, %c8_i32 : i32
    %1 = tpu.assume_multiple %0, 8 : i32
    %c0 = arith.constant 0 : index
    %c0_0 = arith.constant 0 : index
    %c0_1 = arith.constant 0 : index
    %2 = vector.load %arg2[%c0, %c0_0, %c0_1] : memref<1x16x32xf32, #tpu.memory_space<vmem>>, vector<1x16x32xf32>
    %3 = vector.shape_cast %2 : vector<1x16x32xf32> to vector<16x32xf32>
    %c0_2 = arith.constant 0 : index
    %c0_3 = arith.constant 0 : index
    %4 = vector.load %arg3[%c0_2, %c0_3] : memref<1x32xf32, #tpu.memory_space<vmem>>, vector<1x32xf32>
    %5 = vector.shape_cast %4 : vector<1x32xf32> to vector<32xf32>
    %c0_4 = arith.constant 0 : index
    %c0_5 = arith.constant 0 : index
    %6 = vector.load %arg4[%c0_4, %c0_5] : memref<1x32xf32, #tpu.memory_space<vmem>>, vector<1x32xf32>
    %7 = vector.shape_cast %6 : vector<1x32xf32> to vector<32xf32>
    %cst = arith.constant dense<0.000000e+00> : vector<16xf32>
    %8 = vector.multi_reduction <add>, %3, %cst [1] : vector<16x32xf32> to vector<16xf32>
    %9 = vector.shape_cast %8 : vector<16xf32> to vector<16x1xf32>
    %cst_6 = arith.constant 3.200000e+01 : f32
    %10 = vector.broadcast %cst_6 : f32 to vector<16x1xf32>
    %11 = arith.divf %9, %10 : vector<16x1xf32>
    %12 = vector.broadcast %11 : vector<16x1xf32> to vector<16x32xf32>
    %13 = arith.subf %3, %12 : vector<16x32xf32>
    %14 = arith.mulf %13, %13 : vector<16x32xf32>
    %cst_7 = arith.constant dense<0.000000e+00> : vector<16xf32>
    %15 = vector.multi_reduction <add>, %14, %cst_7 [1] : vector<16x32xf32> to vector<16xf32>
    %16 = vector.shape_cast %15 : vector<16xf32> to vector<16x1xf32>
    %cst_8 = arith.constant 3.200000e+01 : f32
    %17 = vector.broadcast %cst_8 : f32 to vector<16x1xf32>
    %18 = arith.divf %16, %17 : vector<16x1xf32>
    %cst_9 = arith.constant 9.99999997E-7 : f32
    %19 = vector.broadcast %cst_9 : f32 to vector<16x1xf32>
    %20 = arith.addf %18, %19 : vector<16x1xf32>
    %21 = math.rsqrt %20 : vector<16x1xf32>
    %22 = vector.broadcast %21 : vector<16x1xf32> to vector<16x32xf32>
    %23 = arith.mulf %13, %22 : vector<16x32xf32>
    %24 = vector.shape_cast %5 : vector<32xf32> to vector<1x32xf32>
    %25 = vector.broadcast %24 : vector<1x32xf32> to vector<16x32xf32>
    %26 = arith.mulf %23, %25 : vector<16x32xf32>
    %27 = vector.shape_cast %7 : vector<32xf32> to vector<1x32xf32>
    %28 = vector.broadcast %27 : vector<1x32xf32> to vector<16x32xf32>
    %29 = arith.addf %26, %28 : vector<16x32xf32>
    %c0_10 = arith.constant 0 : index
    %c0_11 = arith.constant 0 : index
    %30 = vector.load %arg5[%c0_10, %c0_11] : memref<32x96xf32, #tpu.memory_space<vmem>>, vector<32x96xf32>
    %cst_12 = arith.constant dense<0.000000e+00> : vector<16x96xf32>
    %31 = tpu.matmul %29, %30, %cst_12 {dimension_numbers = #tpu.dot_dimension_numbers<[1], [0], [0], [1], [0, 0, 1, 1], [], []>} : vector<16x32xf32>, vector<32x96xf32>, vector<16x96xf32> -> vector<16x96xf32>
    %c0_13 = arith.constant 0 : index
    %c0_14 = arith.constant 0 : index
    %32 = vector.load %arg6[%c0_13, %c0_14] : memref<1x96xf32, #tpu.memory_space<vmem>>, vector<1x96xf32>
    %33 = vector.shape_cast %32 : vector<1x96xf32> to vector<96xf32>
    %34 = vector.shape_cast %33 : vector<96xf32> to vector<1x96xf32>
    %35 = vector.broadcast %34 : vector<1x96xf32> to vector<16x96xf32>
    %36 = arith.addf %31, %35 : vector<16x96xf32>
    %c0_15 = arith.constant 0 : index
    %c0_16 = arith.constant 0 : index
    %37 = vector.load %arg17[%c0_15, %c0_16] : memref<16x96xf32, #tpu.memory_space<vmem>>, vector<16x96xf32>
    tpu.vector_store %arg17[%c0_15, %c0_16], %36 {strides = array<i32>} : memref<16x96xf32, #tpu.memory_space<vmem>>, vector<16x96xf32>,
    %38 = arith.index_cast %1 : i32 to index
    %c0_17 = arith.constant 0 : index
    %39 = vector.load %arg17[%38, %c0_17] : memref<16x96xf32, #tpu.memory_space<vmem>>, vector<8x8xf32>
    %c0_18 = arith.constant 0 : index
    %c32 = arith.constant 32 : index
    %40 = vector.load %arg17[%c0_18, %c32] : memref<16x96xf32, #tpu.memory_space<vmem>>, vector<16x8xf32>
    %c0_19 = arith.constant 0 : index
    %c64 = arith.constant 64 : index
    %41 = vector.load %arg17[%c0_19, %c64] : memref<16x96xf32, #tpu.memory_space<vmem>>, vector<16x8xf32>
    %cst_20 = arith.constant dense<0.000000e+00> : vector<8x16xf32>
    %42 = tpu.matmul %39, %40, %cst_20 {dimension_numbers = #tpu.dot_dimension_numbers<[1], [1], [0], [0], [0, 0, 1, 0], [], []>} : vector<8x8xf32>, vector<16x8xf32>, vector<8x16xf32> -> vector<8x16xf32>
    %cst_21 = arith.constant dense<0xFF800000> : vector<8xf32>
    %43 = vector.multi_reduction <maximumf>, %42, %cst_21 [1] : vector<8x16xf32> to vector<8xf32>
    %44 = vector.shape_cast %43 : vector<8xf32> to vector<8x1xf32>
    %45 = vector.broadcast %44 : vector<8x1xf32> to vector<8x16xf32>
    %46 = arith.subf %42, %45 : vector<8x16xf32>
    %47 = math.exp %46 : vector<8x16xf32>
    %cst_22 = arith.constant dense<0.000000e+00> : vector<8xf32>
    %48 = vector.multi_reduction <add>, %47, %cst_22 [1] : vector<8x16xf32> to vector<8xf32>
    %49 = vector.shape_cast %48 : vector<8xf32> to vector<8x1xf32>
    %50 = tpu.reciprocal %49 {approx = true} : vector<8x1xf32> -> vector<8x1xf32>
    %51 = arith.mulf %49, %50 : vector<8x1xf32>
    %cst_23 = arith.constant 2.000000e+00 : f32
    %52 = vector.broadcast %cst_23 : f32 to vector<8x1xf32>
    %53 = arith.subf %52, %51 : vector<8x1xf32>
    %54 = arith.mulf %50, %53 : vector<8x1xf32>
    %55 = vector.broadcast %54 : vector<8x1xf32> to vector<8x16xf32>
    %56 = arith.mulf %47, %55 : vector<8x16xf32>
    %c0_24 = arith.constant 0 : index
    %c0_25 = arith.constant 0 : index
    %c0_26 = arith.constant 0 : index
    %c0_27 = arith.constant 0 : index
    %57 = vector.load %arg16[%c0_24, %c0_25, %c0_26, %c0_27] : memref<1x4x8x16xf32, #tpu.memory_space<vmem>>, vector<1x1x8x16xf32>
    %58 = vector.shape_cast %57 : vector<1x1x8x16xf32> to vector<8x16xf32>
    %59 = vector.shape_cast %56 : vector<8x16xf32> to vector<1x1x8x16xf32>
    tpu.vector_store %arg16[%c0_24, %c0_25, %c0_26, %c0_27], %59 {strides = array<i32>} : memref<1x4x8x16xf32, #tpu.memory_space<vmem>>, vector<1x1x8x16xf32>,
    %cst_28 = arith.constant dense<0.000000e+00> : vector<8x8xf32>
    %60 = tpu.matmul %56, %41, %cst_28 {dimension_numbers = #tpu.dot_dimension_numbers<[1], [0], [0], [1], [0, 0, 1, 1], [], []>} : vector<8x16xf32>, vector<16x8xf32>, vector<8x8xf32> -> vector<8x8xf32>
    %c0_29 = arith.constant 0 : index
    %c0_30 = arith.constant 0 : index
    %61 = vector.load %arg18[%c0_29, %c0_30] : memref<8x32xf32, #tpu.memory_space<vmem>>, vector<8x8xf32>
    tpu.vector_store %arg18[%c0_29, %c0_30], %60 {strides = array<i32>} : memref<8x32xf32, #tpu.memory_space<vmem>>, vector<8x8xf32>,
    %62 = arith.index_cast %1 : i32 to index
    %c8 = arith.constant 8 : index
    %63 = vector.load %arg17[%62, %c8] : memref<16x96xf32, #tpu.memory_space<vmem>>, vector<8x8xf32>
    %c0_31 = arith.constant 0 : index
    %c40 = arith.constant 40 : index
    %64 = vector.load %arg17[%c0_31, %c40] : memref<16x96xf32, #tpu.memory_space<vmem>>, vector<16x8xf32>
    %c0_32 = arith.constant 0 : index
    %c72 = arith.constant 72 : index
    %65 = vector.load %arg17[%c0_32, %c72] : memref<16x96xf32, #tpu.memory_space<vmem>>, vector<16x8xf32>
    %cst_33 = arith.constant dense<0.000000e+00> : vector<8x16xf32>
    %66 = tpu.matmul %63, %64, %cst_33 {dimension_numbers = #tpu.dot_dimension_numbers<[1], [1], [0], [0], [0, 0, 1, 0], [], []>} : vector<8x8xf32>, vector<16x8xf32>, vector<8x16xf32> -> vector<8x16xf32>
    %cst_34 = arith.constant dense<0xFF800000> : vector<8xf32>
    %67 = vector.multi_reduction <maximumf>, %66, %cst_34 [1] : vector<8x16xf32> to vector<8xf32>
    %68 = vector.shape_cast %67 : vector<8xf32> to vector<8x1xf32>
    %69 = vector.broadcast %68 : vector<8x1xf32> to vector<8x16xf32>
    %70 = arith.subf %66, %69 : vector<8x16xf32>
    %71 = math.exp %70 : vector<8x16xf32>
    %cst_35 = arith.constant dense<0.000000e+00> : vector<8xf32>
    %72 = vector.multi_reduction <add>, %71, %cst_35 [1] : vector<8x16xf32> to vector<8xf32>
    %73 = vector.shape_cast %72 : vector<8xf32> to vector<8x1xf32>
    %74 = tpu.reciprocal %73 {approx = true} : vector<8x1xf32> -> vector<8x1xf32>
    %75 = arith.mulf %73, %74 : vector<8x1xf32>
    %cst_36 = arith.constant 2.000000e+00 : f32
    %76 = vector.broadcast %cst_36 : f32 to vector<8x1xf32>
    %77 = arith.subf %76, %75 : vector<8x1xf32>
    %78 = arith.mulf %74, %77 : vector<8x1xf32>
    %79 = vector.broadcast %78 : vector<8x1xf32> to vector<8x16xf32>
    %80 = arith.mulf %71, %79 : vector<8x16xf32>
    %c0_37 = arith.constant 0 : index
    %c1 = arith.constant 1 : index
    %c0_38 = arith.constant 0 : index
    %c0_39 = arith.constant 0 : index
    %81 = vector.load %arg16[%c0_37, %c1, %c0_38, %c0_39] : memref<1x4x8x16xf32, #tpu.memory_space<vmem>>, vector<1x1x8x16xf32>
    %82 = vector.shape_cast %81 : vector<1x1x8x16xf32> to vector<8x16xf32>
    %83 = vector.shape_cast %80 : vector<8x16xf32> to vector<1x1x8x16xf32>
    tpu.vector_store %arg16[%c0_37, %c1, %c0_38, %c0_39], %83 {strides = array<i32>} : memref<1x4x8x16xf32, #tpu.memory_space<vmem>>, vector<1x1x8x16xf32>,
    %cst_40 = arith.constant dense<0.000000e+00> : vector<8x8xf32>
    %84 = tpu.matmul %80, %65, %cst_40 {dimension_numbers = #tpu.dot_dimension_numbers<[1], [0], [0], [1], [0, 0, 1, 1], [], []>} : vector<8x16xf32>, vector<16x8xf32>, vector<8x8xf32> -> vector<8x8xf32>
    %c0_41 = arith.constant 0 : index
    %c8_42 = arith.constant 8 : index
    %85 = vector.load %arg18[%c0_41, %c8_42] : memref<8x32xf32, #tpu.memory_space<vmem>>, vector<8x8xf32>
    tpu.vector_store %arg18[%c0_41, %c8_42], %84 {strides = array<i32>} : memref<8x32xf32, #tpu.memory_space<vmem>>, vector<8x8xf32>,
    %86 = arith.index_cast %1 : i32 to index
    %c16 = arith.constant 16 : index
    %87 = vector.load %arg17[%86, %c16] : memref<16x96xf32, #tpu.memory_space<vmem>>, vector<8x8xf32>
    %c0_43 = arith.constant 0 : index
    %c48 = arith.constant 48 : index
    %88 = vector.load %arg17[%c0_43, %c48] : memref<16x96xf32, #tpu.memory_space<vmem>>, vector<16x8xf32>
    %c0_44 = arith.constant 0 : index
    %c80 = arith.constant 80 : index
    %89 = vector.load %arg17[%c0_44, %c80] : memref<16x96xf32, #tpu.memory_space<vmem>>, vector<16x8xf32>
    %cst_45 = arith.constant dense<0.000000e+00> : vector<8x16xf32>
    %90 = tpu.matmul %87, %88, %cst_45 {dimension_numbers = #tpu.dot_dimension_numbers<[1], [1], [0], [0], [0, 0, 1, 0], [], []>} : vector<8x8xf32>, vector<16x8xf32>, vector<8x16xf32> -> vector<8x16xf32>
    %cst_46 = arith.constant dense<0xFF800000> : vector<8xf32>
    %91 = vector.multi_reduction <maximumf>, %90, %cst_46 [1] : vector<8x16xf32> to vector<8xf32>
    %92 = vector.shape_cast %91 : vector<8xf32> to vector<8x1xf32>
    %93 = vector.broadcast %92 : vector<8x1xf32> to vector<8x16xf32>
    %94 = arith.subf %90, %93 : vector<8x16xf32>
    %95 = math.exp %94 : vector<8x16xf32>
    %cst_47 = arith.constant dense<0.000000e+00> : vector<8xf32>
    %96 = vector.multi_reduction <add>, %95, %cst_47 [1] : vector<8x16xf32> to vector<8xf32>
    %97 = vector.shape_cast %96 : vector<8xf32> to vector<8x1xf32>
    %98 = tpu.reciprocal %97 {approx = true} : vector<8x1xf32> -> vector<8x1xf32>
    %99 = arith.mulf %97, %98 : vector<8x1xf32>
    %cst_48 = arith.constant 2.000000e+00 : f32
    %100 = vector.broadcast %cst_48 : f32 to vector<8x1xf32>
    %101 = arith.subf %100, %99 : vector<8x1xf32>
    %102 = arith.mulf %98, %101 : vector<8x1xf32>
    %103 = vector.broadcast %102 : vector<8x1xf32> to vector<8x16xf32>
    %104 = arith.mulf %95, %103 : vector<8x16xf32>
    %c0_49 = arith.constant 0 : index
    %c2 = arith.constant 2 : index
    %c0_50 = arith.constant 0 : index
    %c0_51 = arith.constant 0 : index
    %105 = vector.load %arg16[%c0_49, %c2, %c0_50, %c0_51] : memref<1x4x8x16xf32, #tpu.memory_space<vmem>>, vector<1x1x8x16xf32>
    %106 = vector.shape_cast %105 : vector<1x1x8x16xf32> to vector<8x16xf32>
    %107 = vector.shape_cast %104 : vector<8x16xf32> to vector<1x1x8x16xf32>
    tpu.vector_store %arg16[%c0_49, %c2, %c0_50, %c0_51], %107 {strides = array<i32>} : memref<1x4x8x16xf32, #tpu.memory_space<vmem>>, vector<1x1x8x16xf32>,
    %cst_52 = arith.constant dense<0.000000e+00> : vector<8x8xf32>
    %108 = tpu.matmul %104, %89, %cst_52 {dimension_numbers = #tpu.dot_dimension_numbers<[1], [0], [0], [1], [0, 0, 1, 1], [], []>} : vector<8x16xf32>, vector<16x8xf32>, vector<8x8xf32> -> vector<8x8xf32>
    %c0_53 = arith.constant 0 : index
    %c16_54 = arith.constant 16 : index
    %109 = vector.load %arg18[%c0_53, %c16_54] : memref<8x32xf32, #tpu.memory_space<vmem>>, vector<8x8xf32>
    tpu.vector_store %arg18[%c0_53, %c16_54], %108 {strides = array<i32>} : memref<8x32xf32, #tpu.memory_space<vmem>>, vector<8x8xf32>,
    %110 = arith.index_cast %1 : i32 to index
    %c24 = arith.constant 24 : index
    %111 = vector.load %arg17[%110, %c24] : memref<16x96xf32, #tpu.memory_space<vmem>>, vector<8x8xf32>
    %c0_55 = arith.constant 0 : index
    %c56 = arith.constant 56 : index
    %112 = vector.load %arg17[%c0_55, %c56] : memref<16x96xf32, #tpu.memory_space<vmem>>, vector<16x8xf32>
    %c0_56 = arith.constant 0 : index
    %c88 = arith.constant 88 : index
    %113 = vector.load %arg17[%c0_56, %c88] : memref<16x96xf32, #tpu.memory_space<vmem>>, vector<16x8xf32>
    %cst_57 = arith.constant dense<0.000000e+00> : vector<8x16xf32>
    %114 = tpu.matmul %111, %112, %cst_57 {dimension_numbers = #tpu.dot_dimension_numbers<[1], [1], [0], [0], [0, 0, 1, 0], [], []>} : vector<8x8xf32>, vector<16x8xf32>, vector<8x16xf32> -> vector<8x16xf32>
    %cst_58 = arith.constant dense<0xFF800000> : vector<8xf32>
    %115 = vector.multi_reduction <maximumf>, %114, %cst_58 [1] : vector<8x16xf32> to vector<8xf32>
    %116 = vector.shape_cast %115 : vector<8xf32> to vector<8x1xf32>
    %117 = vector.broadcast %116 : vector<8x1xf32> to vector<8x16xf32>
    %118 = arith.subf %114, %117 : vector<8x16xf32>
    %119 = math.exp %118 : vector<8x16xf32>
    %cst_59 = arith.constant dense<0.000000e+00> : vector<8xf32>
    %120 = vector.multi_reduction <add>, %119, %cst_59 [1] : vector<8x16xf32> to vector<8xf32>
    %121 = vector.shape_cast %120 : vector<8xf32> to vector<8x1xf32>
    %122 = tpu.reciprocal %121 {approx = true} : vector<8x1xf32> -> vector<8x1xf32>
    %123 = arith.mulf %121, %122 : vector<8x1xf32>
    %cst_60 = arith.constant 2.000000e+00 : f32
    %124 = vector.broadcast %cst_60 : f32 to vector<8x1xf32>
    %125 = arith.subf %124, %123 : vector<8x1xf32>
    %126 = arith.mulf %122, %125 : vector<8x1xf32>
    %127 = vector.broadcast %126 : vector<8x1xf32> to vector<8x16xf32>
    %128 = arith.mulf %119, %127 : vector<8x16xf32>
    %c0_61 = arith.constant 0 : index
    %c3 = arith.constant 3 : index
    %c0_62 = arith.constant 0 : index
    %c0_63 = arith.constant 0 : index
    %129 = vector.load %arg16[%c0_61, %c3, %c0_62, %c0_63] : memref<1x4x8x16xf32, #tpu.memory_space<vmem>>, vector<1x1x8x16xf32>
    %130 = vector.shape_cast %129 : vector<1x1x8x16xf32> to vector<8x16xf32>
    %131 = vector.shape_cast %128 : vector<8x16xf32> to vector<1x1x8x16xf32>
    tpu.vector_store %arg16[%c0_61, %c3, %c0_62, %c0_63], %131 {strides = array<i32>} : memref<1x4x8x16xf32, #tpu.memory_space<vmem>>, vector<1x1x8x16xf32>,
    %cst_64 = arith.constant dense<0.000000e+00> : vector<8x8xf32>
    %132 = tpu.matmul %128, %113, %cst_64 {dimension_numbers = #tpu.dot_dimension_numbers<[1], [0], [0], [1], [0, 0, 1, 1], [], []>} : vector<8x16xf32>, vector<16x8xf32>, vector<8x8xf32> -> vector<8x8xf32>
    %c0_65 = arith.constant 0 : index
    %c24_66 = arith.constant 24 : index
    %133 = vector.load %arg18[%c0_65, %c24_66] : memref<8x32xf32, #tpu.memory_space<vmem>>, vector<8x8xf32>
    tpu.vector_store %arg18[%c0_65, %c24_66], %132 {strides = array<i32>} : memref<8x32xf32, #tpu.memory_space<vmem>>, vector<8x8xf32>,
    %c0_67 = arith.constant 0 : index
    %c0_68 = arith.constant 0 : index
    %134 = vector.load %arg18[%c0_67, %c0_68] : memref<8x32xf32, #tpu.memory_space<vmem>>, vector<8x32xf32>
    %c0_69 = arith.constant 0 : index
    %c0_70 = arith.constant 0 : index
    %135 = vector.load %arg7[%c0_69, %c0_70] : memref<32x32xf32, #tpu.memory_space<vmem>>, vector<32x32xf32>
    %cst_71 = arith.constant dense<0.000000e+00> : vector<8x32xf32>
    %136 = tpu.matmul %134, %135, %cst_71 {dimension_numbers = #tpu.dot_dimension_numbers<[1], [0], [0], [1], [0, 0, 1, 1], [], []>} : vector<8x32xf32>, vector<32x32xf32>, vector<8x32xf32> -> vector<8x32xf32>
    %c0_72 = arith.constant 0 : index
    %c0_73 = arith.constant 0 : index
    %137 = vector.load %arg8[%c0_72, %c0_73] : memref<1x32xf32, #tpu.memory_space<vmem>>, vector<1x32xf32>
    %138 = vector.shape_cast %137 : vector<1x32xf32> to vector<32xf32>
    %139 = vector.shape_cast %138 : vector<32xf32> to vector<1x32xf32>
    %140 = vector.broadcast %139 : vector<1x32xf32> to vector<8x32xf32>
    %141 = arith.addf %136, %140 : vector<8x32xf32>
    %c0_74 = arith.constant 0 : index
    %142 = arith.index_cast %1 : i32 to index
    %c0_75 = arith.constant 0 : index
    %143 = vector.load %arg2[%c0_74, %142, %c0_75] : memref<1x16x32xf32, #tpu.memory_space<vmem>>, vector<1x8x32xf32>
    %144 = vector.shape_cast %143 : vector<1x8x32xf32> to vector<8x32xf32>
    %145 = arith.addf %144, %141 : vector<8x32xf32>
    %c0_76 = arith.constant 0 : index
    %c0_77 = arith.constant 0 : index
    %146 = vector.load %arg9[%c0_76, %c0_77] : memref<1x32xf32, #tpu.memory_space<vmem>>, vector<1x32xf32>
    %147 = vector.shape_cast %146 : vector<1x32xf32> to vector<32xf32>
    %c0_78 = arith.constant 0 : index
    %c0_79 = arith.constant 0 : index
    %148 = vector.load %arg10[%c0_78, %c0_79] : memref<1x32xf32, #tpu.memory_space<vmem>>, vector<1x32xf32>
    %149 = vector.shape_cast %148 : vector<1x32xf32> to vector<32xf32>
    %cst_80 = arith.constant dense<0.000000e+00> : vector<8xf32>
    %150 = vector.multi_reduction <add>, %145, %cst_80 [1] : vector<8x32xf32> to vector<8xf32>
    %151 = vector.shape_cast %150 : vector<8xf32> to vector<8x1xf32>
    %cst_81 = arith.constant 3.200000e+01 : f32
    %152 = vector.broadcast %cst_81 : f32 to vector<8x1xf32>
    %153 = arith.divf %151, %152 : vector<8x1xf32>
    %154 = vector.broadcast %153 : vector<8x1xf32> to vector<8x32xf32>
    %155 = arith.subf %145, %154 : vector<8x32xf32>
    %156 = arith.mulf %155, %155 : vector<8x32xf32>
    %cst_82 = arith.constant dense<0.000000e+00> : vector<8xf32>
    %157 = vector.multi_reduction <add>, %156, %cst_82 [1] : vector<8x32xf32> to vector<8xf32>
    %158 = vector.shape_cast %157 : vector<8xf32> to vector<8x1xf32>
    %cst_83 = arith.constant 3.200000e+01 : f32
    %159 = vector.broadcast %cst_83 : f32 to vector<8x1xf32>
    %160 = arith.divf %158, %159 : vector<8x1xf32>
    %cst_84 = arith.constant 9.99999997E-7 : f32
    %161 = vector.broadcast %cst_84 : f32 to vector<8x1xf32>
    %162 = arith.addf %160, %161 : vector<8x1xf32>
    %163 = math.rsqrt %162 : vector<8x1xf32>
    %164 = vector.broadcast %163 : vector<8x1xf32> to vector<8x32xf32>
    %165 = arith.mulf %155, %164 : vector<8x32xf32>
    %166 = vector.shape_cast %147 : vector<32xf32> to vector<1x32xf32>
    %167 = vector.broadcast %166 : vector<1x32xf32> to vector<8x32xf32>
    %168 = arith.mulf %165, %167 : vector<8x32xf32>
    %169 = vector.shape_cast %149 : vector<32xf32> to vector<1x32xf32>
    %170 = vector.broadcast %169 : vector<1x32xf32> to vector<8x32xf32>
    %171 = arith.addf %168, %170 : vector<8x32xf32>
    %c0_85 = arith.constant 0 : index
    %c0_86 = arith.constant 0 : index
    %172 = vector.load %arg11[%c0_85, %c0_86] : memref<32x64xf32, #tpu.memory_space<vmem>>, vector<32x64xf32>
    %cst_87 = arith.constant dense<0.000000e+00> : vector<8x64xf32>
    %173 = tpu.matmul %171, %172, %cst_87 {dimension_numbers = #tpu.dot_dimension_numbers<[1], [0], [0], [1], [0, 0, 1, 1], [], []>} : vector<8x32xf32>, vector<32x64xf32>, vector<8x64xf32> -> vector<8x64xf32>
    %c0_88 = arith.constant 0 : index
    %c0_89 = arith.constant 0 : index
    %174 = vector.load %arg12[%c0_88, %c0_89] : memref<1x64xf32, #tpu.memory_space<vmem>>, vector<1x64xf32>
    %175 = vector.shape_cast %174 : vector<1x64xf32> to vector<64xf32>
    %176 = vector.shape_cast %175 : vector<64xf32> to vector<1x64xf32>
    %177 = vector.broadcast %176 : vector<1x64xf32> to vector<8x64xf32>
    %178 = arith.addf %173, %177 : vector<8x64xf32>
    %cst_90 = arith.constant 5.000000e-01 : f32
    %179 = vector.broadcast %cst_90 : f32 to vector<8x64xf32>
    %180 = arith.mulf %179, %178 : vector<8x64xf32>
    %cst_91 = arith.constant 0.707106769 : f32
    %181 = vector.broadcast %cst_91 : f32 to vector<8x64xf32>
    %182 = arith.mulf %178, %181 : vector<8x64xf32>
    %183 = math.absf %182 : vector<8x64xf32>
    %cst_92 = arith.constant 0.327591091 : f32
    %184 = vector.broadcast %cst_92 : f32 to vector<8x64xf32>
    %185 = arith.mulf %184, %183 : vector<8x64xf32>
    %cst_93 = arith.constant 1.000000e+00 : f32
    %186 = vector.broadcast %cst_93 : f32 to vector<8x64xf32>
    %187 = arith.addf %186, %185 : vector<8x64xf32>
    %188 = tpu.reciprocal %187 {approx = true} : vector<8x64xf32> -> vector<8x64xf32>
    %189 = arith.mulf %187, %188 : vector<8x64xf32>
    %cst_94 = arith.constant 2.000000e+00 : f32
    %190 = vector.broadcast %cst_94 : f32 to vector<8x64xf32>
    %191 = arith.subf %190, %189 : vector<8x64xf32>
    %192 = arith.mulf %188, %191 : vector<8x64xf32>
    %cst_95 = arith.constant 1.06140542 : f32
    %193 = vector.broadcast %cst_95 : f32 to vector<8x64xf32>
    %194 = arith.mulf %193, %192 : vector<8x64xf32>
    %cst_96 = arith.constant -1.45315206 : f32
    %195 = vector.broadcast %cst_96 : f32 to vector<8x64xf32>
    %196 = arith.addf %194, %195 : vector<8x64xf32>
    %197 = arith.mulf %196, %192 : vector<8x64xf32>
    %cst_97 = arith.constant 1.42141378 : f32
    %198 = vector.broadcast %cst_97 : f32 to vector<8x64xf32>
    %199 = arith.addf %197, %198 : vector<8x64xf32>
    %200 = arith.mulf %199, %192 : vector<8x64xf32>
    %cst_98 = arith.constant -0.284496725 : f32
    %201 = vector.broadcast %cst_98 : f32 to vector<8x64xf32>
    %202 = arith.addf %200, %201 : vector<8x64xf32>
    %203 = arith.mulf %202, %192 : vector<8x64xf32>
    %cst_99 = arith.constant 0.254829586 : f32
    %204 = vector.broadcast %cst_99 : f32 to vector<8x64xf32>
    %205 = arith.addf %203, %204 : vector<8x64xf32>
    %206 = arith.mulf %205, %192 : vector<8x64xf32>
    %cst_100 = arith.constant 0.000000e+00 : f32
    %207 = vector.broadcast %cst_100 : f32 to vector<8x64xf32>
    %208 = arith.subf %207, %183 : vector<8x64xf32>
    %209 = arith.mulf %208, %183 : vector<8x64xf32>
    %210 = math.exp %209 : vector<8x64xf32>
    %211 = arith.mulf %206, %210 : vector<8x64xf32>
    %cst_101 = arith.constant 1.000000e+00 : f32
    %212 = vector.broadcast %cst_101 : f32 to vector<8x64xf32>
    %213 = arith.subf %212, %211 : vector<8x64xf32>
    %cst_102 = arith.constant 0.000000e+00 : f32
    %214 = vector.broadcast %cst_102 : f32 to vector<8x64xf32>
    %215 = arith.cmpf oge, %182, %214 : vector<8x64xf32>
    %cst_103 = arith.constant 0.000000e+00 : f32
    %216 = vector.broadcast %cst_103 : f32 to vector<8x64xf32>
    %217 = arith.subf %216, %213 : vector<8x64xf32>
    %218 = arith.select %215, %213, %217 : vector<8x64xi1>, vector<8x64xf32>
    %cst_104 = arith.constant 1.000000e+00 : f32
    %219 = vector.broadcast %cst_104 : f32 to vector<8x64xf32>
    %220 = arith.addf %219, %218 : vector<8x64xf32>
    %221 = arith.mulf %180, %220 : vector<8x64xf32>
    %c0_105 = arith.constant 0 : index
    %c0_106 = arith.constant 0 : index
    %222 = vector.load %arg13[%c0_105, %c0_106] : memref<64x32xf32, #tpu.memory_space<vmem>>, vector<64x32xf32>
    %cst_107 = arith.constant dense<0.000000e+00> : vector<8x32xf32>
    %223 = tpu.matmul %221, %222, %cst_107 {dimension_numbers = #tpu.dot_dimension_numbers<[1], [0], [0], [1], [0, 0, 1, 1], [], []>} : vector<8x64xf32>, vector<64x32xf32>, vector<8x32xf32> -> vector<8x32xf32>
    %c0_108 = arith.constant 0 : index
    %c0_109 = arith.constant 0 : index
    %224 = vector.load %arg14[%c0_108, %c0_109] : memref<1x32xf32, #tpu.memory_space<vmem>>, vector<1x32xf32>
    %225 = vector.shape_cast %224 : vector<1x32xf32> to vector<32xf32>
    %226 = vector.shape_cast %225 : vector<32xf32> to vector<1x32xf32>
    %227 = vector.broadcast %226 : vector<1x32xf32> to vector<8x32xf32>
    %228 = arith.addf %223, %227 : vector<8x32xf32>
    %229 = arith.addf %145, %228 : vector<8x32xf32>
    %c0_110 = arith.constant 0 : index
    %c0_111 = arith.constant 0 : index
    %c0_112 = arith.constant 0 : index
    %230 = vector.load %arg15[%c0_110, %c0_111, %c0_112] : memref<1x8x32xf32, #tpu.memory_space<vmem>>, vector<1x8x32xf32>
    %231 = vector.shape_cast %230 : vector<1x8x32xf32> to vector<8x32xf32>
    %232 = vector.shape_cast %229 : vector<8x32xf32> to vector<1x8x32xf32>
    tpu.vector_store %arg15[%c0_110, %c0_111, %c0_112], %232 {strides = array<i32>} : memref<1x8x32xf32, #tpu.memory_space<vmem>>, vector<1x8x32xf32>,
    return
  }
  func.func @transform_0(%arg0: i32, %arg1: i32) -> (i32, i32, i32) {
    %c0_i32 = arith.constant 0 : i32
    %c0_i32_0 = arith.constant 0 : i32
    %c0_i32_1 = arith.constant 0 : i32
    return %arg0, %c0_i32, %c0_i32_0 : i32, i32, i32
  }
  func.func @transform_1(%arg0: i32, %arg1: i32) -> (i32, i32) {
    %c0_i32 = arith.constant 0 : i32
    %c0_i32_0 = arith.constant 0 : i32
    %c0_i32_1 = arith.constant 0 : i32
    return %c0_i32, %c0_i32_0 : i32, i32
  }
  func.func @transform_2(%arg0: i32, %arg1: i32) -> (i32, i32) {
    %c0_i32 = arith.constant 0 : i32
    %c0_i32_0 = arith.constant 0 : i32
    %c0_i32_1 = arith.constant 0 : i32
    return %c0_i32, %c0_i32_0 : i32, i32
  }
  func.func @transform_3(%arg0: i32, %arg1: i32) -> (i32, i32) {
    %c0_i32 = arith.constant 0 : i32
    %c0_i32_0 = arith.constant 0 : i32
    %c0_i32_1 = arith.constant 0 : i32
    return %c0_i32, %c0_i32_0 : i32, i32
  }
  func.func @transform_4(%arg0: i32, %arg1: i32) -> (i32, i32) {
    %c0_i32 = arith.constant 0 : i32
    %c0_i32_0 = arith.constant 0 : i32
    %c0_i32_1 = arith.constant 0 : i32
    return %c0_i32, %c0_i32_0 : i32, i32
  }
  func.func @transform_5(%arg0: i32, %arg1: i32) -> (i32, i32) {
    %c0_i32 = arith.constant 0 : i32
    %c0_i32_0 = arith.constant 0 : i32
    %c0_i32_1 = arith.constant 0 : i32
    return %c0_i32, %c0_i32_0 : i32, i32
  }
  func.func @transform_6(%arg0: i32, %arg1: i32) -> (i32, i32) {
    %c0_i32 = arith.constant 0 : i32
    %c0_i32_0 = arith.constant 0 : i32
    %c0_i32_1 = arith.constant 0 : i32
    return %c0_i32, %c0_i32_0 : i32, i32
  }
  func.func @transform_7(%arg0: i32, %arg1: i32) -> (i32, i32) {
    %c0_i32 = arith.constant 0 : i32
    %c0_i32_0 = arith.constant 0 : i32
    %c0_i32_1 = arith.constant 0 : i32
    return %c0_i32, %c0_i32_0 : i32, i32
  }
  func.func @transform_8(%arg0: i32, %arg1: i32) -> (i32, i32) {
    %c0_i32 = arith.constant 0 : i32
    %c0_i32_0 = arith.constant 0 : i32
    %c0_i32_1 = arith.constant 0 : i32
    return %c0_i32, %c0_i32_0 : i32, i32
  }
  func.func @transform_9(%arg0: i32, %arg1: i32) -> (i32, i32) {
    %c0_i32 = arith.constant 0 : i32
    %c0_i32_0 = arith.constant 0 : i32
    %c0_i32_1 = arith.constant 0 : i32
    return %c0_i32, %c0_i32_0 : i32, i32
  }
  func.func @transform_10(%arg0: i32, %arg1: i32) -> (i32, i32) {
    %c0_i32 = arith.constant 0 : i32
    %c0_i32_0 = arith.constant 0 : i32
    %c0_i32_1 = arith.constant 0 : i32
    return %c0_i32, %c0_i32_0 : i32, i32
  }
  func.func @transform_11(%arg0: i32, %arg1: i32) -> (i32, i32) {
    %c0_i32 = arith.constant 0 : i32
    %c0_i32_0 = arith.constant 0 : i32
    %c0_i32_1 = arith.constant 0 : i32
    return %c0_i32, %c0_i32_0 : i32, i32
  }
  func.func @transform_12(%arg0: i32, %arg1: i32) -> (i32, i32) {
    %c0_i32 = arith.constant 0 : i32
    %c0_i32_0 = arith.constant 0 : i32
    %c0_i32_1 = arith.constant 0 : i32
    return %c0_i32, %c0_i32_0 : i32, i32
  }
  func.func @transform_13(%arg0: i32, %arg1: i32) -> (i32, i32, i32) {
    %c0_i32 = arith.constant 0 : i32
    %c0_i32_0 = arith.constant 0 : i32
    return %arg0, %arg1, %c0_i32 : i32, i32, i32
  }
  func.func @transform_14(%arg0: i32, %arg1: i32) -> (i32, i32, i32, i32) {
    %c0_i32 = arith.constant 0 : i32
    %c0_i32_0 = arith.constant 0 : i32
    %c0_i32_1 = arith.constant 0 : i32
    return %arg0, %c0_i32, %arg1, %c0_i32_0 : i32, i32, i32, i32
  }
}

</mosaic_0001>

<bundles_post_ra>
// kernel: tpu_custom_call.1
= control target key start
LH: loop header
LB: loop body
LE: loop exit
PB: predicated region body
PF: predicated region fallthrough
CT: control target
= control target key end

     0   :  { %s2997_s0 = inlined_call_operand.vmem [shape: f32[2,16,32], index: 0, kind: input, shape index: {}]   ;;  %s2998_s1 = inlined_call_operand.vmem [shape: f32[1,32], index: 1, kind: input, shape index: {}]   ;;  %s2999_s2 = inlined_call_operand.vmem [shape: f32[1,32], index: 2, kind: input, shape index: {}]   ;;  %s3000_s3 = inlined_call_operand.vmem [shape: f32[32,96], index: 3, kind: input, shape index: {}]   ;;  %s3001_s4 = inlined_call_operand.vmem [shape: f32[1,96], index: 4, kind: input, shape index: {}]   ;;  %s3002_s5 = inlined_call_operand.vmem [shape: f32[32,32], index: 5, kind: input, shape index: {}]   ;;  %s3003_s6 = inlined_call_operand.vmem [shape: f32[1,32], index: 6, kind: input, shape index: {}]   ;;  %s3004_s7 = inlined_call_operand.vmem [shape: f32[1,32], index: 7, kind: input, shape index: {}]   ;;  %s3005_s8 = inlined_call_operand.vmem [shape: f32[1,32], index: 8, kind: input, shape index: {}]   ;;  %s3006_s9 = inlined_call_operand.hbm [shape: f32[32,64], index: 9, kind: input, shape index: {}]   ;;  %s3007_s10 = inlined_call_operand.vmem [shape: f32[1,64], index: 10, kind: input, shape index: {}]   ;;  %s3008_s11 = inlined_call_operand.vmem [shape: f32[64,32], index: 11, kind: input, shape index: {}]   ;;  %s3009_s12 = inlined_call_operand.vmem [shape: f32[1,32], index: 12, kind: input, shape index: {}]   ;;  %s3010_s13 = inlined_call_operand.hbm [shape: f32[2,16,32], index: 13, kind: output, shape index: {0}]   ;;  %s3011_s14 = inlined_call_operand.hbm [shape: f32[2,4,16,16], index: 14, kind: output, shape index: {1}]  }
   0x1   :  { %3024 = sst [smem:[#allocation20_spill]] %s2997_s0 }
   0x2   :  { %3025 = sst [smem:[#allocation21_spill]] %s2998_s1 }
   0x3   :  { %3026 = sst [smem:[#allocation22_spill]] %s2999_s2 }
   0x4   :  { %3027 = sst [smem:[#allocation23_spill]] %s3000_s3 }
   0x5   :  { %3028 = sst [smem:[#allocation24_spill]] %s3001_s4 }
   0x6   :  { %3029 = sst [smem:[#allocation25_spill]] %s3002_s5 }
   0x7   :  { %3030 = sst [smem:[#allocation26_spill]] %s3003_s6 }
   0x8   :  { %3031 = sst [smem:[#allocation27_spill]] %s3009_s12 }
   0x9   :  { %3032 = sst [smem:[#allocation28_spill]] %s3010_s13 }
   0xa   :  { %20 = vsyncpa [#allocation5], 0 }
   0xb   :  { %21 = vsyncpa [#allocation6], 0 }
   0xc   :  { %23 = vsyncpa [#allocation6 + $0x1], 0 }
   0xd   :  { %24 = vsyncpa [#allocation9], 0 }
   0xe   :  { %26 = vsyncpa [#allocation9 + $0x1], 0  ;;  %s2587_s29 = smov 0   ;;  %s2589_s30 = smov 0  }
   0xf   :  { %s2591_s15 = smov 0   ;;  %s2593_s16 = smov 0  }
  0x10   :  { %s2595_s17 = smov 0   ;;  %s2597_s18 = smov 0  }
  0x11   :  { %s2599_s19 = smov 0   ;;  %s2601_s20 = smov 0  }
  0x12 LB: > { %3033 = sst [smem:[#allocation13_spill]] %s2458_s29  ;;  %s1884_s21 = sadd.s32 4294967295, %s2486_s20   ;;  %s2486_s20 = sphi %s2601_s20, %s32_s20   ;;  %s2482_s19 = sphi %s2599_s19, %s3067_s19   ;;  %s2478_s18 = sphi %s2597_s18, %s3066_s18   ;;  %s2474_s17 = sphi %s2595_s17, %s3065_s17   ;;  %s2470_s16 = sphi %s2593_s16, %s3064_s16   ;;  %s2466_s15 = sphi %s2591_s15, %s3070_s15   ;;  %s2462_s30 = sphi %s2589_s30, %s3069_s30   ;;  %s2458_s29 = sphi %s2587_s29, %s3068_s29  }
  0x13   : > { %3034 = sst [smem:[#allocation14_spill]] %s2478_s18  ;;  %s1885_s22 = sadd.s32 4294967294, %s2486_s20  }
  0x14   : > { %3035 = sst [smem:[#allocation15_spill]] %s2482_s19  ;;  %s41_s23 = sadd.s32 1, %s2478_s18 }
  0x15   : > { %s44_s24 = sadd.s32 1, %s2482_s19  ;;  %p42_p0 = scmp.ge.s32.totalorder %s41_s23, 2 }
  0x16   : > { %s331_s25 = sadd.s32 1, %s2466_s15  ;;  %p341_p1 = scmp.ne.s32.totalorder %s2466_s15, %s2462_s30 }
  0x17   : > { %p342_p2 = scmp.eq.s32.totalorder %s1884_s21, 3  ;;  %s3072_s23 = smov (%p42_p0, %s41_s23), 0 }
  0x18   : > { %3036 = sst [smem:[#allocation16_spill]] %s3072_s23  ;;  %s3074_s24 = smov (!%p42_p0, %s44_s24), %s2482_s19 }
  0x19   : > { %s327_s26 = ssub.s32 %s2478_s18, %s3072_s23  ;;  %p2639_p3 = por %p342_p2, %p341_p1 }
  0x1a   : > { %p46_p4 = scmp.ge.s32.totalorder %s3074_s24, 2  ;;  %p347_p5 = scmp.ne.s32.totalorder %s2462_s30, %s2458_s29 }
  0x1b   : > { %s3037_s27 = scalar_select %p2639_p3, 1, 0 }
  0x1c   : > { %p348_p6 = scmp.eq.s32.totalorder %s1885_s22, 3  ;;  %p1886_p7 = scmp.ge.s32.totalorder %s2486_s20, 1 }
  0x1d   : > { %s3076_s24 = smov (%p46_p4, %s3074_s24), 0  ;;  %p383_p9 = scmp.lt.s32.totalorder %s2486_s20, 5 }
  0x1e   : > { %3038 = sst [smem:[#allocation17_spill]] %s3076_s24  ;;  %p2648_p8 = por %p348_p6, %p347_p5 }
  0x1f   : > { %s326_s13 = ssub.s32 %s2482_s19, %s3076_s24  ;;  %p2655_p10 = pnand %p1886_p7, %p383_p9 }
  0x20   : > { %s3039_s28 = scalar_select %p2648_p8, 1, 0 }
  0x21   : > { %s328_s12 = sor.u32 %s327_s26, %s326_s13  ;;  %p2659_p12 = scmp.eq.s32.totalorder %s1884_s21, 0 }
  0x22   : > { %3040 = sst [smem:[#allocation18_spill]] %s3039_s28  ;;  %p329_p11 = scmp.eq.s32.totalorder %s328_s12, 0 }
  0x23   : > { %s3041_s23 = scalar_select %p2655_p10, 1, 0 }
  0x24   : > { %s3042_s18 = scalar_select %p2659_p12, 1, 0 }
  0x25   : > { %p2162_p13 = pneg %p2655_p10  ;;  %s2488_s29 = smov [#allocation4]  }
  0x26   : > { %s2666_s22 = scalar_select %p329_p11, %s2466_s15, %s331_s25  }
  0x27   : > { %s419_s28 = sshll.u32 %s2488_s29, 4  ;;  %p2670_p0 = pnand %p2659_p12, %p2162_p13  ;;  %s420_s28 = int_to_ptr.vmem [resolvable:$true] %s419_s28 }
  0x28   : > { %3043 = sst [smem:[#allocation19_spill]] %s2666_s22  ;;  %s2328_s21 = scalar_lea.hbm %s3006_s9, 512 }
  0x29   : > { %p2329_p1 = scmp.ne.s32.totalorder %s3006_s9, %s2328_s21  ;;  %p2330_p2 = pneg %p2670_p0 }
  0x2a   : > { %p2335_p6 = scmp.lt.u32.totalorder %s2328_s21, %s3006_s9 }
  0x2b   : > { %p2331_p4 = pnand %p2330_p2, %p2329_p1 }
  0x2d   : > { %p2332_p5 = pneg %p2331_p4 }
  0x2f   : > { %p2337_p7 = pnand %p2335_p6, %p2332_p5 }
  0x31   : > { %2340 = shalt.err (!%p2337_p7)
}
  0x32   : > { %s2341_s22 = scalar_lea.vmem %s420_s28, 512  ;;  %p2349_p8 = scmp.lt.s32.totalorder %s420_s28, %s420_s28 }
  0x33   : > { %p2342_p9 = scmp.ne.s32.totalorder %s420_s28, %s2341_s22  ;;  %p2350_p3 = scmp.lt.s32.totalorder %s2341_s22, %s2341_s22 }
  0x35   : > { %p2344_p11 = pnand %p2342_p9, %p2330_p2  ;;  %p2351_p12 = por %p2350_p3, %p2349_p8 }
  0x37   : > { %p2345_p13 = pneg %p2344_p11 }
  0x39   : > { %p2352_p10 = pnand %p2351_p12, %p2345_p13 }
  0x3b   : > { %2355 = shalt.err (!%p2352_p10)
}
  0x3c   : > { %s2489_s19 = smov 128   ;;  %s2490_s24 = smov 8  }
  0x3d   : > { %2165 = dma.hbm_to_vmem [thread:$0]  (!%p2670_p0), %s3006_s9, 512, %s420_s28, [#allocation5], %s2489_s19, %s2489_s19, %s2490_s24  }
  0x3e   : > { %p3045_p1 = scmp.ne.s32.totalorder %s3041_s23, 0 }
  0x3f   : > { %p3046_p4 = scmp.ne.s32.totalorder (!%p3045_p1), %s3042_s18, 0 }
  0x40   : > { %452 = sbr.rel (%p3045_p1) target bundleno = 3731 (0xe93), region = 72 }
  0x47   : > { %2445 = dma.done.wait (%p3046_p4), [#allocation5], 512  }
  0x48   : > { %2447 = vsyncadd (%p3046_p4), [#allocation5], 4294966784  ;;  %p503_p3 = scmp.lt.s32.totalorder %s2474_s17, 1  ;;  %s3047_s0 = sld [smem:[#allocation20_spill]]  ;;  %vm513_vm0 = vcmask 261120   ;;  %vm649_vm1 = vcmask 785408  }
  0x49   : > { %s3048_s3 = sld [smem:[#allocation23_spill]]  ;;  %s3049_s1 = sld [smem:[#allocation21_spill]]  ;;  %v2491_v41 = vmov 0.0|0.0   ;;  %vm2492_vm2 = vmmov 0   ;;  %v2493_v42 = vmov 0.0   ;;  %vm662_vm3 = vcmask 64512  }
  0x4a   : > { %s504_s22 = scalar_select %p503_p3, %s2474_s17, 1  ;;  %2106 = vmatprep.subr.bf16.mxu0 %v2491_v41  ;;  %2008 = vmatprep.mubr.msk.f32.mxu0 %vm2492_vm2, %v2493_v42  ;;  %vm2750_vm4 = vmpackc.low %vm662_vm3, %vm662_vm3  ;;  %vm740_vm5 = vcmask 130048   ;;  %vm1023_vm6 = vcmask 130112   ;;  %vm1212_vm7 = vcmask 195712   ;;  %vm1401_vm8 = vcmask 261312  }
  0x4b   : > { %s3050_s2 = sld [smem:[#allocation22_spill]]  ;;  %s3051_s4 = sld [smem:[#allocation24_spill]]  ;;  %vm1648_vm10 = vcmask 523264  }
  0x4c   : > { %s1936_s21 = sshll.u32 %s504_s22, 4  ;;  %s1895_s19 = sshll.u32 %s2470_s16, 3 }
  0x4d   : > { %s2494_s24 = smov 88   ;;  %s2495_s26 = smov 96  }
  0x4e   : > { %s2701_s25 = scalar_lea.vmem %s3047_s0, %s1936_s21  ;;  %s652_s12 = scalar_lea.vmem [#allocation2], %s1895_s19 }
  0x4f   : > { %v509_v0 = vld [vmem:[%s2701_s25] sm:$0xff]  ;;  %v510_v1 = vld [vmem:[%s2701_s25 + $0x8] sm:$0xff]  ;;  %v559_v16 = vld [vmem:[%s3048_s3 + $0x10] sm:$0xff]  ;;  %s2496_s22 = smov 120   ;;  %s2497_s21 = smov 64  }
  0x50   : > { %v514_v2 = vsel %vm513_vm0, %v509_v0, 0.0  ;;  %v517_v3 = vsel %vm513_vm0, %v510_v1, 0.0  ;;  %v557_v14 = vld [vmem:[%s3048_s3] sm:$0xff]  ;;  %v558_v15 = vld [vmem:[%s3048_s3 + $0x8] sm:$0xff]  ;;  %v560_v18 = vld [vmem:[%s3048_s3 + $0x18] sm:$0xff]  ;;  %s2498_s29 = smov 80  }
  0x51   : > { %515 = vadd.xlane.f32.xlu0 %v514_v2  ;;  %v2094_v17 = vpack.c.bf16 %v558_v15, %v557_v14  ;;  %v2098_v19 = vpack.c.bf16 %v560_v18, %v559_v16  ;;  %v1896_v27 = vld [vmem:[%s3049_s1] ss:$0 sm:$0xff]  ;;  %s2499_s13 = smov 112   ;;  %s2500_s18 = smov 56  }
  0x52   : > { %v1897_v29 = vld [vmem:[%s3050_s2] ss:$0 sm:$0xff]  ;;  %s2777_s23 = sand.u32 1, %s2462_s30   ;;  %s3054_s5 = sld [smem:[#allocation25_spill]] }
  0x53   : > { %2095 = vmatprep.subr.bf16.mxu1 %v2094_v17  ;;  %v1898_v36 = vld [vmem:[%s3051_s4] ss:$0 sm:$0xff]  ;;  %s1892_s28 = sshll.u32 %s2777_s23, 5  ;;  %s3055_s6 = sld [smem:[#allocation26_spill]] }
  0x54   : > { %2097 = vmatpush3.bf16.msra.mxu1 %v2094_v17  ;;  %p3056_p10 = scmp.ne.s32.totalorder %s3037_s27, 0 }
  0x55   : > { %518 = vadd.xlane.f32.xlu0 %v517_v3  ;;  %2099 = vmatprep.subr.bf16.mxu1 %v2098_v19 }
  0x58   : > { %2101 = vmatpush3.bf16.msra.mxu1 %v2098_v19 }
  0x59   : > { %2102 = vmatprep.subr.bf16.mxu1 %v2491_v41 }
  0xde   : > { %v516_v4 = vpop.xlane.xlu0 %515 }
  0xdf   : > { %v521_v5 = vmul.f32 0.03125, %v516_v4 }
  0xe1   : > { %v523_v6 = vsub.f32 %v509_v0, %v521_v5 }
  0xe2   : > { %v519_v7 = vpop.xlane.xlu0 %518 }
  0xe3   : > { %v522_v8 = vmul.f32 0.03125, %v519_v7  ;;  %v525_v9 = vmul.f32 %v523_v6, %v523_v6 }
  0xe5   : > { %v524_v10 = vsub.f32 %v510_v1, %v522_v8  ;;  %v527_v11 = vsel %vm513_vm0, %v525_v9, 0.0 }
  0xe6   : > { %528 = vadd.xlane.f32.xlu1 %v527_v11 }
  0xe7   : > { %v526_v12 = vmul.f32 %v524_v10, %v524_v10 }
  0xe9   : > { %v530_v13 = vsel %vm513_vm0, %v526_v12, 0.0 }
  0xea   : > { %531 = vadd.xlane.f32.xlu1 %v530_v13 }
 0x173   : > { %v529_v20 = vpop.xlane.xlu1 %528 }
 0x174   : > { %v533_v21 = vmul.f32 0.03125, %v529_v20 }
 0x176   : > { %v535_v22 = vadd.f32 1e-06, %v533_v21 }
 0x177   : > { %v532_v23 = vpop.xlane.xlu1 %531 }
 0x178   : > { %2302 = vrsqrt.f32 %v535_v22  ;;  %v534_v24 = vmul.f32 0.03125, %v532_v23 }
 0x17a   : > { %v536_v25 = vadd.f32 1e-06, %v534_v24 }
 0x17c   : > { %2304 = vrsqrt.f32 %v536_v25 }
 0x182   : > { %v2303_v26 = vpop.eup %2302 }
 0x183   : > { %v539_v28 = vmul.f32 %v2303_v26, %v523_v6 }
 0x185   : > { %v547_v30 = vmul.f32 %v1896_v27, %v539_v28 }
 0x186   : > { %v2305_v31 = vpop.eup %2304 }
 0x187   : > { %v540_v32 = vmul.f32 %v2305_v31, %v524_v10  ;;  %v555_v33 = vadd.f32 %v1897_v29, %v547_v30 }
 0x189   : > { %v548_v34 = vmul.f32 %v1896_v27, %v540_v32  ;;  %1994 = vmatprep.mubr.msk.f32.mxu1 %vm513_vm0, %v555_v33 }
 0x18b   : > { %v556_v35 = vadd.f32 %v1897_v29, %v548_v34 }
 0x18d   : > { %1995 = vmatmul.mubr.msk.f32.vlgmr.msra.gmra.mrb[0].mxu1 %vm513_vm0, %v556_v35 }
 0x18e   : > { %2001 = vmatprep.mubr.msk.f32.mxu1 %vm2492_vm2, %v2493_v42 }
 0x260   : > { %v1996_v37 = vpop.f32.mrb[0].mxu1 }
 0x261   : > { %v646_v38 = vadd.f32 %v1996_v37, %v1898_v36  ;;  %v640_v39 = vpop.f32.mrb[1].mxu1 }
 0x262   : > { %v641_v40 = vadd.f32 %v1898_v36, %v640_v39 }
 0x263   : > { %651 = vst.msk [vmem:[#allocation2 + $0x8] sm:$0xff] %vm649_vm1, %v646_v38 }
 0x264   : > { %650 = vst.msk [vmem:[#allocation2] sm:$0xff] %vm649_vm1, %v641_v40 }
 0x26a   : > { %v838_v43 = vld [vmem:[#allocation2 + $0x8] sm:$0xff] }
 0x26b   : > { %v837_v44 = vld [vmem:[#allocation2] sm:$0xff] }
 0x26c   : > { %v2739_v45 = vpack.i.bf16 %v838_v43, %v837_v44  ;;  %v2745_v46 = vld [vmem:[%s652_s12] sm:$0xff]  ;;  %s2502_s12 = smov 104  }
 0x26e   : > { %2268 = vrot.lane.b32.xlu1 %v2739_v45, %s2494_s24  ;;  %2263 = vrot.lane.b32.xlu0 %v2739_v45, %s2495_s26  ;;  %s2781_s24 = scalar_lea.vmem [#allocation8], %s1892_s28  ;;  %s2501_s26 = smov 72  }
 0x272   : > { %840 = vrot.lane.b32.xlu1 %v2745_v46, %s2496_s22  ;;  %s2503_s22 = smov 48  }
 0x2e0   : > { %v2264_v47 = vpop.permute.xlu0 %2263  ;;  %v2269_v52 = vpop.permute.xlu1 %2268 }
 0x2e1   : > { %v2266_v48 = vunpack.i.h.bf16 %v2264_v47  ;;  %v2265_v49 = vunpack.i.l.bf16 %v2264_v47  ;;  %v2271_v53 = vunpack.i.h.bf16 %v2269_v52  ;;  %v2270_v54 = vunpack.i.l.bf16 %v2269_v52 }
 0x2e3   : > { %v2103_v51 = vpack.c.bf16 %v2266_v48, %v2265_v49  ;;  %v2110_v55 = vpack.c.bf16 %v2271_v53, %v2270_v54 }
 0x2e4   : > { %v841_v56 = vpop.permute.xlu1 %840 }
 0x2e5   : > { %2105 = vmatpush3.bf16.xpose.msk.msra.mxu1 %vm2750_vm4, %v2103_v51 }
 0x2e6   : > { %2109 = vmatprep.subr.bf16.mxu1 %v2491_v41 }
 0x2ec   : > { %2002 = vmatmul.mubr.msk.f32.vlgmr.msra.gmra.mrb[2].mxu1 %vm662_vm3, %v2745_v46 }
 0x2ed   : > { %2112 = vmatpush3.bf16.xpose.msk.msra.mxu1 %vm2750_vm4, %v2110_v55  ;;  %2015 = vmatprep.mubr.msk.f32.mxu1 %vm2492_vm2, %v2493_v42 }
 0x2ee   : > { %2120 = vmatprep.subr.bf16.mxu1 %v2491_v41 }
 0x2f4   : > { %2016 = vmatmul.mubr.msk.f32.vlgmr.msra.gmra.mrb[4].mxu1 %vm662_vm3, %v841_v56 }
 0x2f5   : > { %2036 = vmatprep.mubr.msk.f32.mxu1 %vm2492_vm2, %v2493_v42 }
 0x3bf   : > { %v736_v57 = vpop.f32.mrb[2].mxu1 }
 0x3c0   : > { %v2003_v58 = vpop.f32.mrb[3].mxu1  ;;  %v741_v59 = vsel %vm740_vm5, %v736_v57, -inf }
 0x3c1   : > { %742 = vmax.xlane.f32.xlu1 %v741_v59 }
 0x3c7   : > { %v920_v60 = vpop.f32.mrb[4].mxu1 }
 0x3c8   : > { %v2017_v61 = vpop.f32.mrb[5].mxu1  ;;  %v924_v62 = vsel %vm740_vm5, %v920_v60, -inf }
 0x3c9   : > { %925 = vmax.xlane.f32.xlu0 %v924_v62 }
 0x3d2   : > { %2273 = vrot.lane.b32.xlu1 %v2739_v45, %s2497_s21  ;;  %s2504_s21 = smov 40  }
 0x3d6   : > { %2283 = vrot.lane.b32.xlu1 %v2739_v45, %s2498_s29  ;;  %s2505_s29 = smov 16  }
 0x3da   : > { %1029 = vrot.lane.b32.xlu1 %v2745_v46, %s2499_s13  ;;  %s3023_s13 = smov 8  }
 0x44e   : > { %v743_v63 = vpop.xlane.xlu1 %742 }
 0x44f   : > { %v744_v0 = vsub.f32 %v736_v57, %v743_v63 }
 0x451   : > { %v745_v1 = vmul.f32 1.442695, %v744_v0 }
 0x452   : > { %v2274_v2 = vpop.permute.xlu1 %2273 }
 0x453   : > { %2306 = vpow2.f32 %v745_v1  ;;  %v2276_v3 = vunpack.i.h.bf16 %v2274_v2  ;;  %v2275_v4 = vunpack.i.l.bf16 %v2274_v2 }
 0x455   : > { %v2107_v5 = vpack.c.bf16 %v2276_v3, %v2275_v4 }
 0x456   : > { %v926_v6 = vpop.xlane.xlu0 %925  ;;  %v2284_v26 = vpop.permute.xlu1 %2283 }
 0x457   : > { %v927_v7 = vsub.f32 %v920_v60, %v926_v6  ;;  %2108 = vmatpush3.bf16.msra.mxu0 %v2107_v5  ;;  %v2286_v28 = vunpack.i.h.bf16 %v2284_v26  ;;  %v2285_v29 = vunpack.i.l.bf16 %v2284_v26 }
 0x458   : > { %2113 = vmatprep.subr.bf16.mxu0 %v2491_v41 }
 0x459   : > { %v928_v8 = vmul.f32 1.442695, %v927_v7  ;;  %v2117_v32 = vpack.c.bf16 %v2286_v28, %v2285_v29 }
 0x45a   : > { %v1030_v33 = vpop.permute.xlu1 %1029 }
 0x45b   : > { %2308 = vpow2.f32 %v928_v8 }
 0x45d   : > { %v2307_v9 = vpop.eup %2306 }
 0x45e   : > { %v747_v10 = vsel %vm740_vm5, %v2307_v9, 0.0 }
 0x45f   : > { %748 = vadd.xlane.f32.xlu0 %v747_v10 }
 0x465   : > { %v2309_v11 = vpop.eup %2308 }
 0x466   : > { %v930_v12 = vsel %vm740_vm5, %v2309_v11, 0.0 }
 0x467   : > { %931 = vadd.xlane.f32.xlu0 %v930_v12 }
 0x47d   : > { %2278 = vrot.lane.b32.xlu0 %v2739_v45, %s2500_s18  ;;  %s2507_s18 = smov 24  }
 0x4ec   : > { %v749_v13 = vpop.xlane.xlu0 %748 }
 0x4ed   : > { %2310 = vrcp.f32 %v749_v13 }
 0x4f4   : > { %v932_v14 = vpop.xlane.xlu0 %931 }
 0x4f5   : > { %2312 = vrcp.f32 %v932_v14 }
 0x4f7   : > { %v2311_v15 = vpop.eup %2310 }
 0x4f8   : > { %v751_v16 = vmul.f32 %v2311_v15, %v749_v13  ;;  %v2279_v17 = vpop.permute.xlu0 %2278 }
 0x4f9   : > { %v2281_v19 = vunpack.i.h.bf16 %v2279_v17  ;;  %v2280_v20 = vunpack.i.l.bf16 %v2279_v17 }
 0x4fa   : > { %v752_v18 = vsub.f32 2.0, %v751_v16 }
 0x4fb   : > { %v2114_v24 = vpack.c.bf16 %v2281_v19, %v2280_v20 }
 0x4fc   : > { %v753_v21 = vmul.f32 %v2311_v15, %v752_v18 }
 0x4fe   : > { %v754_v22 = vmul.f32 %v2307_v9, %v753_v21  ;;  %v1404_v21 = vld [vmem:[%s3054_s5] sm:$0xff] }
 0x4ff   : > { %v2313_v23 = vpop.eup %2312 }
 0x500   : > { %v934_v25 = vmul.f32 %v2313_v23, %v932_v14  ;;  %2009 = vmatmul.mubr.msk.f32.vlgmr.msra.gmra.mrb[0].mxu0 %vm740_vm5, %v754_v22  ;;  %755 = vst.msk [vmem:[%s2781_s24] sm:$0xff] %vm740_vm5, %v754_v22  ;;  %v1405_v22 = vld [vmem:[%s3054_s5 + $0x8] sm:$0xff] }
 0x501   : > { %2115 = vmatpush3.bf16.msra.mxu0 %v2114_v24  ;;  %2022 = vmatprep.mubr.msk.f32.mxu0 %vm2492_vm2, %v2493_v42  ;;  %v1406_v24 = vld [vmem:[%s3054_s5 + $0x10] sm:$0xff] }
 0x502   : > { %v935_v27 = vsub.f32 2.0, %v934_v25  ;;  %2116 = vmatprep.subr.bf16.mxu0 %v2491_v41  ;;  %v1407_v25 = vld [vmem:[%s3054_s5 + $0x18] sm:$0xff] }
 0x503   : > { %v2134_v26 = vpack.c.bf16 %v1407_v25, %v1406_v24 }
 0x504   : > { %v936_v30 = vmul.f32 %v2313_v23, %v935_v27  ;;  %v2131_v23 = vpack.c.bf16 %v1405_v22, %v1404_v21 }
 0x506   : > { %v937_v31 = vmul.f32 %v2309_v11, %v936_v30 }
 0x508   : > { %2023 = vmatmul.mubr.msk.f32.vlgmr.msra.gmra.mrb[2].mxu0 %vm740_vm5, %v937_v31  ;;  %1908 = vst.msk [vmem:[%s2781_s24 + $0x8] sm:$0xff] %vm740_vm5, %v937_v31  ;;  %v1920_v31 = vld [vmem:[%s3055_s6] ss:$0 sm:$0xff] }
 0x509   : > { %2029 = vmatprep.mubr.msk.f32.mxu0 %vm2492_vm2, %v2493_v42 }
 0x50a   : > { %2119 = vmatpush3.bf16.xpose.msk.msra.mxu0 %vm2750_vm4, %v2117_v32 }
 0x50b   : > { %2127 = vmatprep.subr.bf16.mxu0 %v2491_v41 }
 0x511   : > { %2030 = vmatmul.mubr.msk.f32.vlgmr.msra.gmra.mrb[4].mxu0 %vm662_vm3, %v1030_v33 }
 0x512   : > { %2050 = vmatprep.mubr.msk.f32.mxu0 %vm2492_vm2, %v2493_v42 }
 0x5d3   : > { %v831_v34 = vpop.f32.mrb[0].mxu0 }
 0x5d4   : > { %835 = vst.msk [vmem:[#allocation3] sm:$0xff] %vm662_vm3, %v831_v34  ;;  %v2010_v35 = vpop.f32.mrb[1].mxu0 }
 0x5db   : > { %v2800_v36 = vpop.f32.mrb[2].mxu0 }
 0x5dc   : > { %v2024_v37 = vpop.f32.mrb[3].mxu0 }
 0x5e4   : > { %v1109_v38 = vpop.f32.mrb[4].mxu0 }
 0x5e5   : > { %v2031_v39 = vpop.f32.mrb[5].mxu0  ;;  %v1113_v40 = vsel %vm740_vm5, %v1109_v38, -inf }
 0x5e6   : > { %1114 = vmax.xlane.f32.xlu1 %v1113_v40 }
 0x5f7   : > { %2293 = vrot.lane.b32.xlu1 %v2739_v45, %s2501_s26  ;;  %s1730_s26 = scalar_lea.sflag [#allocation9], %s2777_s23 }
 0x5fb   : > { %1218 = vrot.lane.b32.xlu1 %v2745_v46, %s2502_s12  ;;  %s1759_s12 = sshll.u32 %s2781_s24, 4  ;;  %s2899_s12 = int_to_ptr.vmem [resolvable:$true] %s1759_s12 }
 0x673   : > { %v1115_v43 = vpop.xlane.xlu1 %1114 }
 0x674   : > { %v1116_v44 = vsub.f32 %v1109_v38, %v1115_v43 }
 0x676   : > { %v1117_v47 = vmul.f32 1.442695, %v1116_v44  ;;  %v1520_v44 = vld [vmem:[#allocation4] sm:$0xff] }
 0x677   : > { %v2294_v56 = vpop.permute.xlu1 %2293 }
 0x678   : > { %2314 = vpow2.f32 %v1117_v47  ;;  %v2296_v59 = vunpack.i.h.bf16 %v2294_v56  ;;  %v2295_v60 = vunpack.i.l.bf16 %v2294_v56  ;;  %v1521_v47 = vld [vmem:[#allocation4 + $0x8] sm:$0xff] }
 0x679   : > { %v1922_v56 = vld [vmem:[%s3004_s7] ss:$0 sm:$0xff] }
 0x67a   : > { %v2124_v63 = vpack.c.bf16 %v2296_v59, %v2295_v60 }
 0x67b   : > { %v1219_v0 = vpop.permute.xlu1 %1218 }
 0x682   : > { %v2315_v48 = vpop.eup %2314 }
 0x683   : > { %v1119_v49 = vsel %vm740_vm5, %v2315_v48, 0.0 }
 0x684   : > { %1120 = vadd.xlane.f32.xlu0 %v1119_v49  ;;  %v1522_v49 = vld [vmem:[#allocation4 + $0x10] sm:$0xff] }
 0x69a   : > { %2288 = vrot.lane.b32.xlu0 %v2739_v45, %s2503_s22  ;;  %s1932_s22 = sshll.u32 %s2474_s17, 3 }
 0x711   : > { %v1121_v51 = vpop.xlane.xlu0 %1120 }
 0x712   : > { %2316 = vrcp.f32 %v1121_v51 }
 0x715   : > { %v2289_v52 = vpop.permute.xlu0 %2288 }
 0x716   : > { %v2291_v53 = vunpack.i.h.bf16 %v2289_v52  ;;  %v2290_v54 = vunpack.i.l.bf16 %v2289_v52 }
 0x718   : > { %v2121_v55 = vpack.c.bf16 %v2291_v53, %v2290_v54 }
 0x71a   : > { %2122 = vmatpush3.bf16.msra.mxu1 %v2121_v55 }
 0x71b   : > { %2123 = vmatprep.subr.bf16.mxu1 %v2491_v41 }
 0x71c   : > { %v2317_v46 = vpop.eup %2316 }
 0x71d   : > { %v1123_v57 = vmul.f32 %v2317_v46, %v1121_v51  ;;  %v1523_v51 = vld [vmem:[#allocation4 + $0x18] sm:$0xff] }
 0x71e   : > { %v2140_v52 = vpack.c.bf16 %v1523_v51, %v1522_v49 }
 0x71f   : > { %v1124_v58 = vsub.f32 2.0, %v1123_v57 }
 0x721   : > { %v1125_v61 = vmul.f32 %v2317_v46, %v1124_v58  ;;  %v1923_v58 = vld [vmem:[%s3005_s8] ss:$0 sm:$0xff] }
 0x723   : > { %v1126_v62 = vmul.f32 %v2315_v48, %v1125_v61  ;;  %v2137_v48 = vpack.c.bf16 %v1521_v47, %v1520_v44  ;;  %v1633_v61 = vld [vmem:[%s3008_s11] sm:$0xff] }
 0x725   : > { %2037 = vmatmul.mubr.msk.f32.vlgmr.msra.gmra.mrb[6].mxu1 %vm740_vm5, %v1126_v62  ;;  %1913 = vst.msk [vmem:[%s2781_s24 + $0x10] sm:$0xff] %vm740_vm5, %v1126_v62  ;;  %v1634_v62 = vld [vmem:[%s3008_s11 + $0x8] sm:$0xff] }
 0x726   : > { %2126 = vmatpush3.bf16.xpose.msk.msra.mxu1 %vm2750_vm4, %v2124_v63  ;;  %2043 = vmatprep.mubr.msk.f32.mxu1 %vm2492_vm2, %v2493_v42  ;;  %v2143_v63 = vpack.c.bf16 %v1634_v62, %v1633_v61 }
 0x727   : > { %2136 = vmatprep.subr.bf16.mxu1 %v2491_v41 }
 0x72d   : > { %2044 = vmatmul.mubr.msk.f32.vlgmr.msra.gmra.mrb[8].mxu1 %vm662_vm3, %v1219_v0  ;;  %v1635_v0 = vld [vmem:[%s3008_s11 + $0x10] sm:$0xff] }
 0x72e   : > { %2072 = vmatprep.mubr.msk.f32.mxu1 %vm2492_vm2, %v2493_v42  ;;  %2138 = vmatpush3.bf16.msra.mxu1 %v2137_v48 }
 0x72f   : > { %2139 = vmatprep.subr.bf16.mxu1 %v2491_v41 }
 0x732   : > { %2141 = vmatpush3.bf16.msra.mxu1 %v2140_v52 }
 0x7f8   : > { %v1204_v1 = vpop.f32.mrb[6].mxu1 }
 0x7f9   : > { %v2038_v2 = vpop.f32.mrb[7].mxu1 }
 0x800   : > { %v1298_v3 = vpop.f32.mrb[8].mxu1 }
 0x801   : > { %v2045_v4 = vpop.f32.mrb[9].mxu1  ;;  %v1302_v5 = vsel %vm740_vm5, %v1298_v3, -inf }
 0x802   : > { %1303 = vmax.xlane.f32.xlu0 %v1302_v5  ;;  %v1638_v4 = vld [vmem:[%s3008_s11 + $0x28] sm:$0xff] }
 0x818   : > { %2298 = vrot.lane.b32.xlu0 %v2739_v45, %s2504_s21  ;;  %s1756_s21 = sadd.s32 %s2470_s16, %s1932_s22 }
 0x81c   : > { %1209 = vrot.lane.b32.xlu0 %v1204_v1, %s2505_s29  ;;  %v1636_v1 = vld [vmem:[%s3008_s11 + $0x18] sm:$0xff]  ;;  %s1933_s29 = sshll.u32 %s1756_s21, 7 }
 0x81d   : > { %v2146_v2 = vpack.c.bf16 %v1636_v1, %v1635_v0  ;;  %s2905_s28 = scalar_lea.hbm %s3011_s14, %s1933_s29 }
 0x88f   : > { %v1304_v50 = vpop.xlane.xlu0 %1303 }
 0x890   : > { %v1305_v6 = vsub.f32 %v1298_v3, %v1304_v50  ;;  %v1637_v3 = vld [vmem:[%s3008_s11 + $0x20] sm:$0xff]  ;;  %v1639_v50 = vld [vmem:[%s3008_s11 + $0x30] sm:$0xff] }
 0x891   : > { %v2149_v5 = vpack.c.bf16 %v1638_v4, %v1637_v3 }
 0x892   : > { %v1306_v7 = vmul.f32 1.442695, %v1305_v6  ;;  %v1640_v6 = vld [vmem:[%s3008_s11 + $0x38] sm:$0xff] }
 0x893   : > { %v2299_v8 = vpop.permute.xlu0 %2298 }
 0x894   : > { %2318 = vpow2.f32 %v1306_v7  ;;  %v2301_v9 = vunpack.i.h.bf16 %v2299_v8  ;;  %v2300_v10 = vunpack.i.l.bf16 %v2299_v8  ;;  %v2152_v7 = vpack.c.bf16 %v1640_v6, %v1639_v50  ;;  %v1924_v8 = vld [vmem:[%s3007_s10] ss:$0 sm:$0xff] }
 0x896   : > { %v2128_v11 = vpack.c.bf16 %v2301_v9, %v2300_v10 }
 0x897   : > { %v1210_v15 = vpop.permute.xlu0 %1209 }
 0x898   : > { %2129 = vmatpush3.bf16.msra.mxu0 %v2128_v11 }
 0x899   : > { %2130 = vmatprep.subr.bf16.mxu0 %v2491_v41 }
 0x89e   : > { %v2319_v12 = vpop.eup %2318 }
 0x89f   : > { %v1308_v13 = vsel %vm740_vm5, %v2319_v12, 0.0 }
 0x8a0   : > { %1309 = vadd.xlane.f32.xlu1 %v1308_v13 }
 0x8b1   : > { %1020 = vrot.lane.b32.xlu1 %v2800_v36, %s3023_s13  ;;  %s1488_s13 = scalar_lea.vmem %s2701_s25, %s1895_s19  ;;  %s2356_s25 = scalar_lea.vmem %s2899_s12, 512 }
 0x8b2   : > { %v1489_v33 = vld [vmem:[%s1488_s13] sm:$0xff]  ;;  %p2357_p8 = scmp.ne.s32.totalorder %s2899_s12, %s2356_s25 }
 0x8b4   : > { %p2358_p12 = pnand %p2357_p8, %p3056_p10 }
 0x8b6   : > { %p2359_p0 = pneg %p2358_p12 }
 0x92d   : > { %v1310_v45 = vpop.xlane.xlu1 %1309 }
 0x92e   : > { %2320 = vrcp.f32 %v1310_v45 }
 0x931   : > { %v1021_v14 = vpop.permute.xlu1 %1020 }
 0x932   : > { %1024 = vst.msk [vmem:[#allocation3] sm:$0xff] %vm1023_vm6, %v1021_v14 }
 0x933   : > { %1213 = vst.msk [vmem:[#allocation3] sm:$0xff] %vm1212_vm7, %v1210_v15 }
 0x938   : > { %v2321_v16 = vpop.eup %2320 }
 0x939   : > { %v1312_v17 = vmul.f32 %v2321_v16, %v1310_v45 }
 0x93b   : > { %v1313_v18 = vsub.f32 2.0, %v1312_v17 }
 0x93d   : > { %v1314_v19 = vmul.f32 %v2321_v16, %v1313_v18 }
 0x93f   : > { %v1315_v20 = vmul.f32 %v2319_v12, %v1314_v19 }
 0x941   : > { %2051 = vmatmul.mubr.msk.f32.vlgmr.msra.gmra.mrb[6].mxu0 %vm740_vm5, %v1315_v20  ;;  %1918 = vst.msk [vmem:[%s2781_s24 + $0x18] sm:$0xff] %vm740_vm5, %v1315_v20  ;;  %s2508_s24 = smov [#allocation8]  }
 0x942   : > { %2061 = vmatprep.mubr.msk.f32.mxu0 %vm2492_vm2, %v2493_v42  ;;  %2132 = vmatpush3.bf16.msra.mxu0 %v2131_v23  ;;  %s2360_s19 = sshll.u32 %s2508_s24, 4  ;;  %s2361_s19 = int_to_ptr.vmem [resolvable:$false] %s2360_s19 }
 0x943   : > { %2133 = vmatprep.subr.bf16.mxu0 %v2491_v41  ;;  %s2362_s0 = scalar_lea.vmem %s2361_s19, 1024  ;;  %p2363_p2 = scmp.lt.s32.totalorder %s2899_s12, %s2361_s19 }
 0x944   : > { %p2364_p5 = scmp.lt.s32.totalorder %s2362_s0, %s2356_s25 }
 0x946   : > { %2135 = vmatpush3.bf16.msra.mxu0 %v2134_v26  ;;  %p2365_p6 = por %p2364_p5, %p2363_p2 }
 0x947   : > { %2142 = vmatprep.subr.bf16.mxu0 %v2491_v41 }
 0x948   : > { %p2366_p7 = pnand %p2365_p6, %p2359_p0 }
 0xa14   : > { %v1393_v27 = vpop.f32.mrb[6].mxu0 }
 0xa15   : > { %1398 = vrot.lane.b32.xlu1 %v1393_v27, %s2507_s18  ;;  %v2052_v28 = vpop.f32.mrb[7].mxu0 }
 0xa87   : > { %v1399_v29 = vpop.permute.xlu1 %1398 }
 0xa88   : > { %1402 = vst.msk [vmem:[#allocation3] sm:$0xff] %vm1401_vm8, %v1399_v29 }
 0xa8f   : > { %v1403_v30 = vld [vmem:[#allocation3] sm:$0xff] }
 0xa90   : > { %2062 = vmatmul.mubr.msk.f32.vlgmr.msra.gmra.mrb[8].mxu0 %vm513_vm0, %v1403_v30 }
 0xa91   : > { %2091 = vmatprep.mubr.msk.f32.mxu0 %vm2492_vm2, %v2493_v42  ;;  %2144 = vmatpush3.bf16.msra.mxu0 %v2143_v63 }
 0xa92   : > { %2145 = vmatprep.subr.bf16.mxu0 %v2491_v41 }
 0xa95   : > { %2147 = vmatpush3.bf16.msra.mxu0 %v2146_v2 }
 0xa96   : > { %2148 = vmatprep.subr.bf16.mxu0 %v2491_v41 }
 0xa99   : > { %2150 = vmatpush3.bf16.msra.mxu0 %v2149_v5 }
 0xa9a   : > { %2151 = vmatprep.subr.bf16.mxu0 %v2491_v41 }
 0xa9d   : > { %2153 = vmatpush3.bf16.msra.mxu0 %v2152_v7 }
 0xb63   : > { %v1484_v32 = vpop.f32.mrb[8].mxu0 }
 0xb64   : > { %v1485_v34 = vadd.f32 %v1920_v31, %v1484_v32  ;;  %v2063_v35 = vpop.f32.mrb[9].mxu0 }
 0xb66   : > { %v2853_v36 = vadd.f32 %v1489_v33, %v1485_v34 }
 0xb68   : > { %v1493_v37 = vsel %vm513_vm0, %v2853_v36, 0.0 }
 0xb69   : > { %1494 = vadd.xlane.f32.xlu0 %v1493_v37 }
 0xbf6   : > { %v1495_v38 = vpop.xlane.xlu0 %1494 }
 0xbf7   : > { %v1496_v39 = vmul.f32 0.03125, %v1495_v38 }
 0xbf9   : > { %v1497_v42 = vsub.f32 %v2853_v36, %v1496_v39 }
 0xbfb   : > { %v1498_v40 = vmul.f32 %v1497_v42, %v1497_v42 }
 0xbfd   : > { %v1499_v43 = vsel %vm513_vm0, %v1498_v40, 0.0 }
 0xbfe   : > { %1500 = vadd.xlane.f32.xlu1 %v1499_v43 }
 0xc8b   : > { %v1501_v53 = vpop.xlane.xlu1 %1500 }
 0xc8c   : > { %v1502_v54 = vmul.f32 0.03125, %v1501_v53 }
 0xc8e   : > { %v1503_v55 = vadd.f32 1e-06, %v1502_v54 }
 0xc90   : > { %2322 = vrsqrt.f32 %v1503_v55 }
 0xc9a   : > { %v2323_v46 = vpop.eup %2322 }
 0xc9b   : > { %v1505_v57 = vmul.f32 %v2323_v46, %v1497_v42 }
 0xc9d   : > { %v1512_v59 = vmul.f32 %v1922_v56, %v1505_v57 }
 0xc9f   : > { %v1519_v60 = vadd.f32 %v1923_v58, %v1512_v59 }
 0xca1   : > { %2073 = vmatmul.mubr.msk.f32.vlgmr.msra.gmra.mrb[10].mxu1 %vm513_vm0, %v1519_v60 }
 0xd74   : > { %v1600_v9 = vpop.f32.mrb[10].mxu1 }
 0xd75   : > { %v1601_v10 = vadd.f32 %v1924_v8, %v1600_v9  ;;  %v2074_v11 = vpop.f32.mrb[11].mxu1 }
 0xd77   : > { %v1605_v12 = vmul.f32 0.70710677, %v1601_v10  ;;  %v1604_v35 = vmul.f32 0.5, %v1601_v10 }
 0xd79   : > { %v1606_v13 = vand.u32 2147483647, %v1605_v12  ;;  %vm1628_vm9 = vcmp.ge.f32.partialorder %v1605_v12, 0.0 }
 0xd7b   : > { %v1607_v41 = vmul.f32 0.3275911, %v1606_v13  ;;  %v1622_v16 = vsub.f32 0.0, %v1606_v13 }
 0xd7d   : > { %v1608_v45 = vadd.f32 1.0, %v1607_v41  ;;  %v1623_v19 = vmul.f32 %v1622_v16, %v1606_v13 }
 0xd7f   : > { %2324 = vrcp.f32 %v1608_v45  ;;  %v1624_v22 = vmul.f32 1.442695, %v1623_v19 }
 0xd81   : > { %2326 = vpow2.f32 %v1624_v22 }
 0xd89   : > { %v2325_v14 = vpop.eup %2324 }
 0xd8a   : > { %v1610_v15 = vmul.f32 %v2325_v14, %v1608_v45 }
 0xd8b   : > { %v2327_v30 = vpop.eup %2326 }
 0xd8c   : > { %v1611_v17 = vsub.f32 2.0, %v1610_v15 }
 0xd8e   : > { %v1612_v18 = vmul.f32 %v2325_v14, %v1611_v17 }
 0xd90   : > { %v1613_v20 = vmul.f32 1.0614054, %v1612_v18 }
 0xd92   : > { %v1614_v21 = vadd.f32 -1.4531521, %v1613_v20 }
 0xd94   : > { %v1615_v23 = vmul.f32 %v1614_v21, %v1612_v18 }
 0xd96   : > { %v1616_v24 = vadd.f32 1.4214138, %v1615_v23 }
 0xd98   : > { %v1617_v25 = vmul.f32 %v1616_v24, %v1612_v18 }
 0xd9a   : > { %v1618_v26 = vadd.f32 -0.28449672, %v1617_v25 }
 0xd9c   : > { %v1619_v27 = vmul.f32 %v1618_v26, %v1612_v18 }
 0xd9e   : > { %v1620_v28 = vadd.f32 0.2548296, %v1619_v27 }
 0xda0   : > { %v1621_v29 = vmul.f32 %v1620_v28, %v1612_v18 }
 0xda2   : > { %v1626_v31 = vmul.f32 %v2327_v30, %v1621_v29 }
 0xda4   : > { %v1627_v32 = vsub.f32 1.0, %v1626_v31 }
 0xda6   : > { %v1629_v33 = vsub.f32 0.0, %v1627_v32 }
 0xda8   : > { %v1630_v34 = vsel %vm1628_vm9, %v1627_v32, %v1629_v33 }
 0xda9   : > { %v1631_v37 = vadd.f32 1.0, %v1630_v34 }
 0xdab   : > { %v1632_v38 = vmul.f32 %v1631_v37, %v1604_v35 }
 0xdad   : > { %2092 = vmatmul.mubr.msk.f32.vlgmr.msra.gmra.mrb[10].mxu0 %vm1648_vm10, %v1632_v38 }
 0xdae   : > { %2369 = shalt.err (!%p2366_p7)
}
 0xdaf   : > { %s2370_s22 = scalar_lea.hbm %s2905_s28, 512  ;;  %s2374_s18 = scalar_lea.hbm %s3011_s14, 2048 }
 0xdb0   : > { %p2371_p9 = scmp.ne.s32.totalorder %s2905_s28, %s2370_s22  ;;  %p2375_p1 = scmp.lt.u32.totalorder %s2905_s28, %s3011_s14 }
 0xdb1   : > { %p2376_p4 = scmp.lt.u32.totalorder %s2374_s18, %s2370_s22  ;;  %p2378_p8 = scmp.lt.u32.totalorder %s2370_s22, %s2905_s28 }
 0xdb2   : > { %p2372_p11 = pnand %p2371_p9, %p3056_p10 }
 0xdb3   : > { %p2377_p3 = por %p2376_p4, %p2375_p1 }
 0xdb4   : > { %p2373_p13 = pneg %p2372_p11 }
 0xdb5   : > { %p2379_p12 = por %p2378_p8, %p2377_p3 }
 0xdb7   : > { %p2380_p0 = pnand %p2379_p12, %p2373_p13 }
 0xdb9   : > { %2383 = shalt.err (!%p2380_p0)
}
 0xdba   : > { %s2509_s0 = smov 128   ;;  %s2510_s25 = smov 256  }
 0xdbb   : > { %s3057_s19 = smov 8   ;;  %s1891_s21 = sshll.u32 %s2777_s23, 3 }
 0xdbc   : > { %2159 = dma.vmem_to_hbm [thread:$0]  (%p3056_p10), %s2899_s12, 512, %s2905_s28, %s1730_s26, %s2509_s0, %s2510_s25, %s3057_s19  }
 0xdbd   : > { %s1930_s29 = sshll.u32 %s2474_s17, 1  ;;  %s3058_s24 = sld [smem:[#allocation27_spill]] }
 0xdbe   : > { %s1741_s22 = sadd.s32 %s2470_s16, %s1930_s29  ;;  %s495_s2 = scalar_lea.vmem [#allocation7], %s1891_s21 }
 0xdbf   : > { %s1931_s1 = sshll.u32 %s1741_s22, 7  ;;  %s1745_s3 = sshll.u32 %s495_s2, 4  ;;  %s2944_s3 = int_to_ptr.vmem [resolvable:$true] %s1745_s3 }
 0xdc0   : > { %s3059_s6 = sld [smem:[#allocation28_spill]]  ;;  %s1725_s16 = scalar_lea.sflag [#allocation6], %s2777_s23 }
 0xdc1   : > { %s2384_s17 = scalar_lea.vmem %s2944_s3, 128  ;;  %s2511_s28 = smov [#allocation7]  }
 0xdc2   : > { %p2385_p2 = scmp.ne.s32.totalorder %s2944_s3, %s2384_s17  ;;  %s2388_s26 = sshll.u32 %s2511_s28, 4  ;;  %s2389_s26 = int_to_ptr.vmem [resolvable:$false] %s2388_s26 }
 0xdc3   : > { %v1926_v39 = vld [vmem:[%s3058_s24] ss:$0 sm:$0xff]  ;;  %s2390_s0 = scalar_lea.vmem %s2389_s26, 256  ;;  %p2391_p7 = scmp.lt.s32.totalorder %s2944_s3, %s2389_s26 }
 0xdc4   : > { %p2386_p5 = pnand %p2385_p2, %p3056_p10  ;;  %p2392_p9 = scmp.lt.s32.totalorder %s2390_s0, %s2384_s17 }
 0xdc6   : > { %s2942_s12 = scalar_lea.hbm %s3059_s6, %s1931_s1  ;;  %p2387_p6 = pneg %p2386_p5 }
 0xdc7   : > { %p2393_p11 = por %p2392_p9, %p2391_p7 }
 0xdc9   : > { %p2394_p13 = pnand %p2393_p11, %p2387_p6 }
 0xe80   : > { %v1718_v42 = vpop.f32.mrb[10].mxu0 }
 0xe81   : > { %v1719_v40 = vadd.f32 %v1926_v39, %v1718_v42  ;;  %v2093_v43 = vpop.f32.mrb[11].mxu0 }
 0xe83   : > { %v1722_v44 = vadd.f32 %v1719_v40, %v2853_v36 }
 0xe85   : > { %1723 = vst.msk [vmem:[%s495_s2] sm:$0xff] %vm513_vm0, %v1722_v44 }
 0xe86   : > { %2397 = shalt.err (!%p2394_p13)
}
 0xe87   : > { %s2398_s1 = scalar_lea.hbm %s2942_s12, 128  ;;  %s2402_s5 = scalar_lea.hbm %s3059_s6, 512 }
 0xe88   : > { %p2399_p1 = scmp.ne.s32.totalorder %s2942_s12, %s2398_s1  ;;  %p2403_p8 = scmp.lt.u32.totalorder %s2942_s12, %s3059_s6 }
 0xe89   : > { %p2404_p12 = scmp.lt.u32.totalorder %s2402_s5, %s2398_s1  ;;  %p2406_p2 = scmp.lt.u32.totalorder %s2398_s1, %s2942_s12 }
 0xe8a   : > { %p2400_p4 = pnand %p2399_p1, %p3056_p10 }
 0xe8b   : > { %p2405_p0 = por %p2404_p12, %p2403_p8 }
 0xe8c   : > { %p2401_p3 = pneg %p2400_p4 }
 0xe8d   : > { %p2407_p5 = por %p2406_p2, %p2405_p0 }
 0xe8f   : > { %p2408_p6 = pnand %p2407_p5, %p2401_p3 }
 0xe91   : > { %2411 = shalt.err (!%p2408_p6)
}
 0xe92   : > { %2158 = dma.vmem_to_hbm [thread:$0]  (%p3056_p10), %s2944_s3, 128, %s2942_s12, %s1725_s16  }
 0xe93 PF: > { %s3060_s19 = sld [smem:[#allocation13_spill]]  ;;  %s3061_s21 = sld [smem:[#allocation18_spill]] }
 0xe94   : > { %p2175_p7 = scmp.ge.s32.totalorder %s2486_s20, 2 }
 0xe99   : > { %s1774_s29 = sand.u32 1, %s3060_s19   ;;  %p3062_p9 = scmp.ne.s32.totalorder %s3061_s21, 0 }
 0xe9a   : > { %s1775_s22 = scalar_lea.sflag [#allocation6], %s1774_s29 }
 0xe9b   : > { %p2167_p11 = pnand %p2175_p7, %p3062_p9 }
 0xe9d   : > { %2449 = dma.done.wait (!%p2167_p11), %s1775_s22, 128  }
 0xe9e   : > { %2451 = vsyncadd (!%p2167_p11), %s1775_s22, 4294967168  ;;  %s1784_s18 = scalar_lea.sflag [#allocation9], %s1774_s29 }
 0xe9f   : > { %2453 = dma.done.wait (!%p2167_p11), %s1784_s18, 512  }
 0xea0   : > { %2455 = vsyncadd (!%p2167_p11), %s1784_s18, 4294966784  ;;  %s32_s20 = sadd.s32 1, %s2486_s20   ;;  %s3063_s3 = sld [smem:[#allocation19_spill]] }
 0xea1   : > { %p29_p13 = scmp.ge.s32.totalorder %s32_s20, 6   ;;  %s3064_s16 = sld [smem:[#allocation14_spill]] }
 0xea2   : > { %s3065_s17 = sld [smem:[#allocation15_spill]]  ;;  %s3066_s18 = sld [smem:[#allocation16_spill]] }
 0xea3   : > { %s3067_s19 = sld [smem:[#allocation17_spill]]  ;;  %s3068_s29 = smov %s2462_s30 }
 0xea4   : > { %s3069_s30 = smov %s2466_s15  ;;  %31 = sbr.rel (!%p29_p13) target bundleno = 18 (0x12), region = 134 }
 0xea6   : > { %s3070_s15 = smov %s3063_s3 }
 0xeab   :  { %1789 = vsyncpa [#allocation5], 1 }
 0xeac   :  { %1791 = vsyncpa [#allocation5 + $0x1], 1 }
 0xead   :  { %1792 = vsyncpa [#allocation6], 1 }
 0xeae   :  { %1794 = vsyncpa [#allocation6 + $0x1], 1 }
 0xeaf   :  { %1795 = vsyncpa [#allocation9], 1 }
 0xeb0   :  { %1797 = vsyncpa [#allocation9 + $0x1], 1 }

</bundles_post_ra>
